<compile_context>
chip_gen: v7x
topology: tpu7x:2x2x1
jax: 0.10.0
libtpu: 0.0.40
codegen_flags: <defaults>
</compile_context>

<pallas_src>
import functools

import jax
import jax.numpy as jnp
from jax.experimental import pallas as pl
from jax.experimental.pallas import tpu as pltpu

_MAX_TILE_N = 2048                   # columns (lane axis) per grid step
_VMEM_LIMIT = 32 * 1024 * 1024       # explicit scoped-VMEM budget (safe on v5e/v6e/v7x)
_MIX_BLOCK_BYTES = 4 * 1024 * 1024   # per-block budget for the spectral-mix kernel


# ----------------------------------------------------------------------------
# Elementwise helpers
# ----------------------------------------------------------------------------
_SQRT_2_OVER_PI = 0.7978845608028654


def _gelu_tanh(x):
    # tanh approximation -> EUP (separate VLIW slot); ~1e-3 max abs error.
    return 0.5 * x * (1.0 + jnp.tanh(_SQRT_2_OVER_PI * (x + 0.044715 * x * x * x)))


def _gelu_erf(x):
    # exact (torch-default) GELU -- used only by the pure-JAX reference
    return 0.5 * x * (1.0 + jax.lax.erf(x * (1.0 / jnp.sqrt(2.0).astype(x.dtype))))


# ----------------------------------------------------------------------------
# Pallas kernels (channels-first slabs: rows = channels, lanes = B*H*W)
# ----------------------------------------------------------------------------
def _pw_kernel(x_ref, w_ref, b_ref, o_ref, *, act):
    # (Cout, Cin) @ (Cin, T) + (Cout, 1)  [+ GELU]
    # Used only for the lifting conv: K = in_ch + 2 is tiny, so f32 operands
    # (bf16 would add rounding for no MXU/DMA win here).
    y = jnp.dot(w_ref[...], x_ref[...], preferred_element_type=jnp.float32)
    y = y + b_ref[...]
    if act:
        y = _gelu_tanh(y)
    o_ref[...] = y.astype(o_ref.dtype)


def _layer_kernel(spec_ref, h_ref, w_ref, b_ref, o_ref, *, act):
    # Fused FNO layer tail: 1x1 skip conv + bias + spectral-conv add [+ GELU].
    # bf16 MXU operands, f32 accumulation; elementwise tail stays f32.
    h = h_ref[...].astype(jnp.bfloat16)
    w = w_ref[...].astype(jnp.bfloat16)
    y = jnp.dot(w, h, preferred_element_type=jnp.float32)
    y = y + b_ref[...] + spec_ref[...]
    if act:
        y = _gelu_tanh(y)
    o_ref[...] = y.astype(o_ref.dtype)


def _proj_kernel(h_ref, w1_ref, b1_ref, w2_ref, b2_ref, o_ref):
    # Fused projection: fc1 + GELU + fc2; the (proj_ch, T) intermediate never
    # touches HBM.
    h = h_ref[...].astype(jnp.bfloat16)
    p = jnp.dot(w1_ref[...].astype(jnp.bfloat16), h,
                preferred_element_type=jnp.float32) + b1_ref[...]
    p = _gelu_tanh(p)
    o = jnp.dot(w2_ref[...].astype(jnp.bfloat16), p.astype(jnp.bfloat16),
                preferred_element_type=jnp.float32) + b2_ref[...]
    o_ref[...] = o.astype(o_ref.dtype)


def _spectral_mix_kernel(xs_ref, ws_ref, ys_ref):
    # Per-Fourier-mode complex channel mix with real/imag stacked:
    #   Xs[m, b, :] = [Re X | Im X]           (B, 2C)
    #   Ws[m, :, :] = [[Wr, Wi], [-Wi, Wr]]   (2C, 2Co)
    #   Ys[m, b, :] = [Re Y | Im Y]           (B, 2Co)
    ys_ref[...] = jnp.einsum(
        "mbc,mco->mbo", xs_ref[...], ws_ref[...],
        preferred_element_type=jnp.float32).astype(ys_ref.dtype)


# ----------------------------------------------------------------------------
# Pallas wrappers
# ----------------------------------------------------------------------------
def _tile_plan(N):
    """Lane-dense column tile: a single fat step if it fits, else <=2048-wide
    tiles; N is padded up to a tile multiple (no divisibility assert)."""
    n_pad = pl.cdiv(N, 128) * 128
    if n_pad <= _MAX_TILE_N:
        return n_pad, n_pad
    tile = _MAX_TILE_N
    return tile, pl.cdiv(N, tile) * tile


def _pad_cols(x, n_pad):
    n = x.shape[-1]
    return x if n == n_pad else jnp.pad(x, ((0, 0), (0, n_pad - n)))


def _pointwise_call(kernel_fn, col_inputs, full_inputs, out_rows, N):
    """Run `kernel_fn` over lane-dense column tiles of (C, N) slabs.

    col_inputs: (rows_i, N) arrays tiled along columns.
    full_inputs: small weight/bias arrays replicated to every grid step.
    """
    tile, n_pad = _tile_plan(N)
    col_inputs = [_pad_cols(a, n_pad) for a in col_inputs]
    in_specs = [pl.BlockSpec((a.shape[0], tile), lambda i: (0, i))
                for a in col_inputs]
    in_specs += [pl.BlockSpec(a.shape, lambda i, nd=a.ndim: (0,) * nd)
                 for a in full_inputs]
    out = pl.pallas_call(
        kernel_fn,
        out_shape=jax.ShapeDtypeStruct((out_rows, n_pad), jnp.float32),
        grid=(n_pad // tile,),
        in_specs=in_specs,
        out_specs=pl.BlockSpec((out_rows, tile), lambda i: (0, i)),
        compiler_params=pltpu.CompilerParams(
            dimension_semantics=("parallel",),
            vmem_limit_bytes=_VMEM_LIMIT),
    )(*col_inputs, *full_inputs)
    return out[:, :N]


def pw_pallas(x_cn, w, b, act):
    cout = w.shape[0]
    return _pointwise_call(functools.partial(_pw_kernel, act=act),
                           [x_cn], [w, b.reshape(cout, 1)], cout, x_cn.shape[1])


def layer_pallas(spec_cn, h_cn, w, b, act):
    cout = w.shape[0]
    return _pointwise_call(functools.partial(_layer_kernel, act=act),
                           [spec_cn, h_cn], [w, b.reshape(cout, 1)],
                           cout, h_cn.shape[1])


def project_pallas(h_cn, w1, b1, w2, b2):
    out_ch = w2.shape[0]
    return _pointwise_call(_proj_kernel, [h_cn],
                           [w1, b1.reshape(-1, 1), w2, b2.reshape(-1, 1)],
                           out_ch, h_cn.shape[1])


def _pick_mode_block(M, B, C2, Co2):
    # Largest power-of-two mode block that divides M and whose
    # (xs + ws bf16, ys f32) block fits the per-block VMEM budget.
    per_mode = (B * C2 + C2 * Co2) * 2 + B * Co2 * 4
    for cand in (256, 128, 64, 32, 16, 8, 4, 2):
        if M % cand == 0 and cand * per_mode <= _MIX_BLOCK_BYTES:
            return cand
    return 1


def mix_pallas(xr, xi, wr, wi):
    M, B, C = xr.shape
    Co = wr.shape[-1]
    # Stack real/imag: one bf16 matmul per mode (K doubled to 2C) instead of 4.
    xs = jnp.concatenate([xr, xi], axis=-1).astype(jnp.bfloat16)             # (M, B, 2C)
    ws = jnp.concatenate(
        [jnp.concatenate([wr, wi], axis=-1),
         jnp.concatenate([-wi, wr], axis=-1)], axis=-2).astype(jnp.bfloat16)  # (M, 2C, 2Co)
    mb = _pick_mode_block(M, B, 2 * C, 2 * Co)
    ys = pl.pallas_call(
        _spectral_mix_kernel,
        out_shape=jax.ShapeDtypeStruct((M, B, 2 * Co), jnp.float32),
        grid=(M // mb,),
        in_specs=[
            pl.BlockSpec((mb, B, 2 * C), lambda i: (i, 0, 0)),
            pl.BlockSpec((mb, 2 * C, 2 * Co), lambda i: (i, 0, 0)),
        ],
        out_specs=pl.BlockSpec((mb, B, 2 * Co), lambda i: (i, 0, 0)),
        compiler_params=pltpu.CompilerParams(
            dimension_semantics=("parallel",),
            vmem_limit_bytes=_VMEM_LIMIT),
    )(xs, ws)
    return ys[..., :Co], ys[..., Co:]


# ----------------------------------------------------------------------------
# Pure-JAX reference ops (f32, exact erf GELU — matches torch semantics)
# ----------------------------------------------------------------------------
def pw_ref(x_cn, w, b, act):
    y = w @ x_cn + b[:, None]
    return _gelu_erf(y) if act else y


def layer_ref(spec_cn, h_cn, w, b, act):
    y = w @ h_cn + b[:, None] + spec_cn
    return _gelu_erf(y) if act else y


def project_ref(h_cn, w1, b1, w2, b2):
    p = _gelu_erf(w1 @ h_cn + b1[:, None])
    return w2 @ p + b2[:, None]


def mix_ref(xr, xi, wr, wi):
    rr = jnp.einsum("mbc,mco->mbo", xr, wr)
    ii = jnp.einsum("mbc,mco->mbo", xi, wi)
    ri = jnp.einsum("mbc,mco->mbo", xr, wi)
    ir = jnp.einsum("mbc,mco->mbo", xi, wr)
    return rr - ii, ri + ir


# ----------------------------------------------------------------------------
# FNO2d forward (shared skeleton; FFT in plain JAX, mixing/matmuls in Pallas)
# ----------------------------------------------------------------------------
def _spectral_conv(h_cn, wr, wi, B, H, W, mh, mw, mix):
    C = h_cn.shape[0]
    assert 2 * mh <= H and mw <= W // 2 + 1, "kept Fourier corners must not overlap"
    x4 = h_cn.reshape(C, B, H, W)                          # zero-cost view of (C, N)
    Xf = jnp.fft.rfft2(x4, axes=(-2, -1))                  # (C, B, H, W//2+1)
    kept = jnp.concatenate([Xf[:, :, :mh, :mw], Xf[:, :, H - mh:, :mw]], axis=2)
    M = 2 * mh * mw
    kept = kept.reshape(C, B, M).transpose(2, 1, 0)        # (M, B, C): tiny tensor
    yr, yi = mix(jnp.real(kept).astype(jnp.float32),
                 jnp.imag(kept).astype(jnp.float32), wr, wi)   # (M, B, Co) each
    Co = wr.shape[-1]
    y = jax.lax.complex(yr, yi).transpose(2, 1, 0).reshape(Co, B, 2 * mh, mw)
    out_ft = jnp.zeros((Co, B, H, W // 2 + 1), jnp.complex64)
    out_ft = out_ft.at[:, :, :mh, :mw].set(y[:, :, :mh])
    out_ft = out_ft.at[:, :, H - mh:, :mw].set(y[:, :, mh:])
    out = jnp.fft.irfft2(out_ft, s=(H, W), axes=(-2, -1))  # (Co, B, H, W)
    return out.reshape(Co, B * H * W)


def _grid_rows(B, H, W):
    # 2-D positional grid embedding (embed_dim = 2), channels-first flattened.
    # (Tiny (2, N) slab; kept outside the kernel to avoid in-kernel vector
    # integer div/mod — lane-dense layout already removes the big transpose.)
    gy = jnp.broadcast_to(
        jnp.linspace(0.0, 1.0, H, dtype=jnp.float32)[None, :, None], (B, H, W))
    gx = jnp.broadcast_to(
        jnp.linspace(0.0, 1.0, W, dtype=jnp.float32)[None, None, :], (B, H, W))
    return jnp.stack([gy.reshape(-1), gx.reshape(-1)], axis=0)  # (2, B*H*W)


def _forward(x_nchw, params, mh, mw, depth, pw, layer, project, mix):
    B, Cin, H, W = x_nchw.shape
    N = B * H * W
    # channels-first flattened layout: rows = channels, lanes = B*H*W
    x_cn = x_nchw.transpose(1, 0, 2, 3).reshape(Cin, N)
    x_aug = jnp.concatenate([x_cn, _grid_rows(B, H, W)], axis=0)   # (Cin+2, N)
    h = pw(x_aug, params["fc0_w"], params["fc0_b"], False)         # (width, N)
    for l in range(depth):
        spec = _spectral_conv(h, params["spec_wr"][l], params["spec_wi"][l],
                              B, H, W, mh, mw, mix)
        h = layer(spec, h, params["skip_w"][l], params["skip_b"][l],
                  l < depth - 1)
    out = project(h, params["fc1_w"], params["fc1_b"],
                  params["fc2_w"], params["fc2_b"])                # (out_ch, N)
    out_ch = params["fc2_w"].shape[0]
    return out.reshape(out_ch, B, H, W).transpose(1, 0, 2, 3)


def fno_forward_pallas(x, params, mh, mw, depth):
    return _forward(x, params, mh, mw, depth,
                    pw_pallas, layer_pallas, project_pallas, mix_pallas)


def fno_forward_ref(x, params, mh, mw, depth):
    return _forward(x, params, mh, mw, depth,
                    pw_ref, layer_ref, project_ref, mix_ref)


# ----------------------------------------------------------------------------
# Deterministic parameter initialization (synthetic, no checkpoint).
# Weights are stored in torch conv1x1 layout: (Cout, Cin).
# ----------------------------------------------------------------------------
def init_params(key, in_ch, out_ch, width, depth, mh, mw, embed_dim, proj_ch):
    M = 2 * mh * mw
    lift_in = in_ch + embed_dim
    keys = iter(jax.random.split(key, 6 + 4 * depth))

    def unif(k, shape, scale):
        return jax.random.uniform(k, shape, jnp.float32, -scale, scale)

    p = {
        "fc0_w": unif(next(keys), (width, lift_in), 1.0 / lift_in),
        "fc0_b": unif(next(keys), (width,), 1.0 / lift_in),
        "fc1_w": unif(next(keys), (proj_ch, width), 1.0 / width),
        "fc1_b": unif(next(keys), (proj_ch,), 1.0 / width),
        "fc2_w": unif(next(keys), (out_ch, proj_ch), 1.0 / proj_ch),
        "fc2_b": unif(next(keys), (out_ch,), 1.0 / proj_ch),
        "spec_wr": [],
        "spec_wi": [],
        "skip_w": [],
        "skip_b": [],
    }
    spec_scale = 1.0 / (width * width)
    for _ in range(depth):
        p["spec_wr"].append(unif(next(keys), (M, width, width), spec_scale))
        p["spec_wi"].append(unif(next(keys), (M, width, width), spec_scale))
        p["skip_w"].append(unif(next(keys), (width, width), 1.0 / width))
        p["skip_b"].append(unif(next(keys), (width,), 1.0 / width))
    return p


# ----------------------------------------------------------------------------
if __name__ == "__main__":
    # Small shapes consistent with FNOBackbone's forward (NCHW input).
    B, in_ch, out_ch = 2, 1, 1
    H = W = 16
    width, depth = 32, 3
    mh, mw = 4, 4          # n_modes_height / n_modes_width (kept Fourier modes)
    embed_dim = 2
    proj_ch = 32

    key = jax.random.PRNGKey(0)
    kx, kp = jax.random.split(key)
    x = jax.random.normal(kx, (B, in_ch, H, W), jnp.float32)
    params = init_params(kp, in_ch, out_ch, width, depth, mh, mw, embed_dim, proj_ch)

    fwd = jax.jit(functools.partial(fno_forward_pallas, mh=mh, mw=mw, depth=depth))
    out = jax.block_until_ready(fwd(x, params))
    assert out.shape == (B, out_ch, H, W), out.shape

    ref = jax.block_until_ready(fno_forward_ref(x, params, mh, mw, depth))
    err = float(jnp.max(jnp.abs(out - ref)))
    scale = float(jnp.max(jnp.abs(ref))) + 1e-6
    assert err <= 5e-2 * scale + 1e-3, f"mismatch vs reference: max_abs_err={err}"

    print("KERNEL_OK")
</pallas_src>

<mosaic_0001>
module attributes {stable_mosaic.version = 11 : i64} {
  func.func @_pw_kernel(%arg0: i32, %arg1: memref<3x512xf32, #tpu.memory_space<vmem>>, %arg2: memref<32x3xf32, #tpu.memory_space<vmem>>, %arg3: memref<32x1xf32, #tpu.memory_space<vmem>>, %arg4: memref<32x512xf32, #tpu.memory_space<vmem>>) attributes {dimension_semantics = [#tpu.dimension_semantics<parallel>], iteration_bounds = array<i64: 1>, scalar_prefetch = 0 : i64, scratch_operands = 0 : i64, tpu.core_type = #tpu.core_type<tc>, window_params = [{transform_indices = @transform_0, window_bounds = array<i64: 3, 512>}, {pipeline_mode = #tpu.pipeline_mode<synchronous>, transform_indices = @transform_1, window_bounds = array<i64: 32, 3>}, {pipeline_mode = #tpu.pipeline_mode<synchronous>, transform_indices = @transform_2, window_bounds = array<i64: 32, 1>}, {transform_indices = @transform_3, window_bounds = array<i64: 32, 512>}]} {
    %c0 = arith.constant 0 : index
    %c0_0 = arith.constant 0 : index
    %0 = vector.load %arg2[%c0, %c0_0] : memref<32x3xf32, #tpu.memory_space<vmem>>, vector<32x3xf32>
    %c0_1 = arith.constant 0 : index
    %c0_2 = arith.constant 0 : index
    %1 = vector.load %arg1[%c0_1, %c0_2] : memref<3x512xf32, #tpu.memory_space<vmem>>, vector<3x512xf32>
    %cst = arith.constant dense<0.000000e+00> : vector<32x512xf32>
    %2 = tpu.matmul %0, %1, %cst {dimension_numbers = #tpu.dot_dimension_numbers<[1], [0], [0], [1], [0, 0, 1, 1], [], []>} : vector<32x3xf32>, vector<3x512xf32>, vector<32x512xf32> -> vector<32x512xf32>
    %c0_3 = arith.constant 0 : index
    %c0_4 = arith.constant 0 : index
    %3 = vector.load %arg3[%c0_3, %c0_4] : memref<32x1xf32, #tpu.memory_space<vmem>>, vector<32x1xf32>
    %4 = vector.broadcast %3 : vector<32x1xf32> to vector<32x512xf32>
    %5 = arith.addf %2, %4 : vector<32x512xf32>
    %c0_5 = arith.constant 0 : index
    %c0_6 = arith.constant 0 : index
    %6 = vector.load %arg4[%c0_5, %c0_6] : memref<32x512xf32, #tpu.memory_space<vmem>>, vector<32x512xf32>
    tpu.vector_store %arg4[%c0_5, %c0_6], %5 {strides = array<i32>} : memref<32x512xf32, #tpu.memory_space<vmem>>, vector<32x512xf32>,
    return
  }
  func.func @transform_0(%arg0: i32) -> (i32, i32) {
    %c0_i32 = arith.constant 0 : i32
    %c0_i32_0 = arith.constant 0 : i32
    return %c0_i32, %arg0 : i32, i32
  }
  func.func @transform_1(%arg0: i32) -> (i32, i32) {
    %c0_i32 = arith.constant 0 : i32
    %c0_i32_0 = arith.constant 0 : i32
    %c0_i32_1 = arith.constant 0 : i32
    return %c0_i32, %c0_i32_0 : i32, i32
  }
  func.func @transform_2(%arg0: i32) -> (i32, i32) {
    %c0_i32 = arith.constant 0 : i32
    %c0_i32_0 = arith.constant 0 : i32
    %c0_i32_1 = arith.constant 0 : i32
    return %c0_i32, %c0_i32_0 : i32, i32
  }
  func.func @transform_3(%arg0: i32) -> (i32, i32) {
    %c0_i32 = arith.constant 0 : i32
    %c0_i32_0 = arith.constant 0 : i32
    return %c0_i32, %arg0 : i32, i32
  }
}

module attributes {stable_mosaic.version = 11 : i64} {
  func.func @_spectral_mix_kernel(%arg0: i32, %arg1: memref<32x2x64xbf16, #tpu.memory_space<vmem>>, %arg2: memref<32x64x64xbf16, #tpu.memory_space<vmem>>, %arg3: memref<32x2x64xf32, #tpu.memory_space<vmem>>) attributes {dimension_semantics = [#tpu.dimension_semantics<parallel>], iteration_bounds = array<i64: 1>, scalar_prefetch = 0 : i64, scratch_operands = 0 : i64, tpu.core_type = #tpu.core_type<tc>, window_params = [{transform_indices = @transform_0, window_bounds = array<i64: 32, 2, 64>}, {transform_indices = @transform_1, window_bounds = array<i64: 32, 64, 64>}, {transform_indices = @transform_2, window_bounds = array<i64: 32, 2, 64>}]} {
    %c0 = arith.constant 0 : index
    %c0_0 = arith.constant 0 : index
    %c0_1 = arith.constant 0 : index
    %0 = vector.load %arg1[%c0, %c0_0, %c0_1] : memref<32x2x64xbf16, #tpu.memory_space<vmem>>, vector<32x2x64xbf16>
    %c0_2 = arith.constant 0 : index
    %c0_3 = arith.constant 0 : index
    %c0_4 = arith.constant 0 : index
    %1 = vector.load %arg2[%c0_2, %c0_3, %c0_4] : memref<32x64x64xbf16, #tpu.memory_space<vmem>>, vector<32x64x64xbf16>
    "tpu.trace_start"() <{level = 10 : i32, message = "mbc,mco->mbo"}> : () -> ()
    %cst = arith.constant dense<0.000000e+00> : vector<32x2x64xf32>
    %2 = tpu.matmul %0, %1, %cst {dimension_numbers = #tpu.dot_dimension_numbers<[2], [1], [1], [2], [0, 0, 0, 1, 1, 2], [0], [0]>} : vector<32x2x64xbf16>, vector<32x64x64xbf16>, vector<32x2x64xf32> -> vector<32x2x64xf32>
    "tpu.trace_stop"() : () -> ()
    %c0_5 = arith.constant 0 : index
    %c0_6 = arith.constant 0 : index
    %c0_7 = arith.constant 0 : index
    %3 = vector.load %arg3[%c0_5, %c0_6, %c0_7] : memref<32x2x64xf32, #tpu.memory_space<vmem>>, vector<32x2x64xf32>
    tpu.vector_store %arg3[%c0_5, %c0_6, %c0_7], %2 {strides = array<i32>} : memref<32x2x64xf32, #tpu.memory_space<vmem>>, vector<32x2x64xf32>,
    return
  }
  func.func @transform_0(%arg0: i32) -> (i32, i32, i32) {
    %c0_i32 = arith.constant 0 : i32
    %c0_i32_0 = arith.constant 0 : i32
    %c0_i32_1 = arith.constant 0 : i32
    return %arg0, %c0_i32, %c0_i32_0 : i32, i32, i32
  }
  func.func @transform_1(%arg0: i32) -> (i32, i32, i32) {
    %c0_i32 = arith.constant 0 : i32
    %c0_i32_0 = arith.constant 0 : i32
    %c0_i32_1 = arith.constant 0 : i32
    return %arg0, %c0_i32, %c0_i32_0 : i32, i32, i32
  }
  func.func @transform_2(%arg0: i32) -> (i32, i32, i32) {
    %c0_i32 = arith.constant 0 : i32
    %c0_i32_0 = arith.constant 0 : i32
    %c0_i32_1 = arith.constant 0 : i32
    return %arg0, %c0_i32, %c0_i32_0 : i32, i32, i32
  }
}

module attributes {stable_mosaic.version = 11 : i64} {
  func.func @_layer_kernel(%arg0: i32, %arg1: memref<32x512xf32, #tpu.memory_space<vmem>>, %arg2: memref<32x512xf32, #tpu.memory_space<vmem>>, %arg3: memref<32x32xf32, #tpu.memory_space<vmem>>, %arg4: memref<32x1xf32, #tpu.memory_space<vmem>>, %arg5: memref<32x512xf32, #tpu.memory_space<vmem>>) attributes {dimension_semantics = [#tpu.dimension_semantics<parallel>], iteration_bounds = array<i64: 1>, scalar_prefetch = 0 : i64, scratch_operands = 0 : i64, tpu.core_type = #tpu.core_type<tc>, window_params = [{transform_indices = @transform_0, window_bounds = array<i64: 32, 512>}, {transform_indices = @transform_1, window_bounds = array<i64: 32, 512>}, {pipeline_mode = #tpu.pipeline_mode<synchronous>, transform_indices = @transform_2, window_bounds = array<i64: 32, 32>}, {pipeline_mode = #tpu.pipeline_mode<synchronous>, transform_indices = @transform_3, window_bounds = array<i64: 32, 1>}, {transform_indices = @transform_4, window_bounds = array<i64: 32, 512>}]} {
    %c0 = arith.constant 0 : index
    %c0_0 = arith.constant 0 : index
    %0 = vector.load %arg2[%c0, %c0_0] : memref<32x512xf32, #tpu.memory_space<vmem>>, vector<32x512xf32>
    %1 = arith.truncf %0 : vector<32x512xf32> to vector<32x512xbf16>
    %c0_1 = arith.constant 0 : index
    %c0_2 = arith.constant 0 : index
    %2 = vector.load %arg3[%c0_1, %c0_2] : memref<32x32xf32, #tpu.memory_space<vmem>>, vector<32x32xf32>
    %3 = arith.truncf %2 : vector<32x32xf32> to vector<32x32xbf16>
    %cst = arith.constant dense<0.000000e+00> : vector<32x512xf32>
    %4 = tpu.matmul %3, %1, %cst {dimension_numbers = #tpu.dot_dimension_numbers<[1], [0], [0], [1], [0, 0, 1, 1], [], []>} : vector<32x32xbf16>, vector<32x512xbf16>, vector<32x512xf32> -> vector<32x512xf32>
    %c0_3 = arith.constant 0 : index
    %c0_4 = arith.constant 0 : index
    %5 = vector.load %arg4[%c0_3, %c0_4] : memref<32x1xf32, #tpu.memory_space<vmem>>, vector<32x1xf32>
    %6 = vector.broadcast %5 : vector<32x1xf32> to vector<32x512xf32>
    %7 = arith.addf %4, %6 : vector<32x512xf32>
    %c0_5 = arith.constant 0 : index
    %c0_6 = arith.constant 0 : index
    %8 = vector.load %arg1[%c0_5, %c0_6] : memref<32x512xf32, #tpu.memory_space<vmem>>, vector<32x512xf32>
    %9 = arith.addf %7, %8 : vector<32x512xf32>
    %cst_7 = arith.constant 5.000000e-01 : f32
    %10 = vector.broadcast %cst_7 : f32 to vector<32x512xf32>
    %11 = arith.mulf %10, %9 : vector<32x512xf32>
    %cst_8 = arith.constant 4.471500e-02 : f32
    %12 = vector.broadcast %cst_8 : f32 to vector<32x512xf32>
    %13 = arith.mulf %12, %9 : vector<32x512xf32>
    %14 = arith.mulf %13, %9 : vector<32x512xf32>
    %15 = arith.mulf %14, %9 : vector<32x512xf32>
    %16 = arith.addf %9, %15 : vector<32x512xf32>
    %cst_9 = arith.constant 0.797884583 : f32
    %17 = vector.broadcast %cst_9 : f32 to vector<32x512xf32>
    %18 = arith.mulf %17, %16 : vector<32x512xf32>
    %19 = math.tanh %18 : vector<32x512xf32>
    %cst_10 = arith.constant 1.000000e+00 : f32
    %20 = vector.broadcast %cst_10 : f32 to vector<32x512xf32>
    %21 = arith.addf %20, %19 : vector<32x512xf32>
    %22 = arith.mulf %11, %21 : vector<32x512xf32>
    %c0_11 = arith.constant 0 : index
    %c0_12 = arith.constant 0 : index
    %23 = vector.load %arg5[%c0_11, %c0_12] : memref<32x512xf32, #tpu.memory_space<vmem>>, vector<32x512xf32>
    tpu.vector_store %arg5[%c0_11, %c0_12], %22 {strides = array<i32>} : memref<32x512xf32, #tpu.memory_space<vmem>>, vector<32x512xf32>,
    return
  }
  func.func @transform_0(%arg0: i32) -> (i32, i32) {
    %c0_i32 = arith.constant 0 : i32
    %c0_i32_0 = arith.constant 0 : i32
    return %c0_i32, %arg0 : i32, i32
  }
  func.func @transform_1(%arg0: i32) -> (i32, i32) {
    %c0_i32 = arith.constant 0 : i32
    %c0_i32_0 = arith.constant 0 : i32
    return %c0_i32, %arg0 : i32, i32
  }
  func.func @transform_2(%arg0: i32) -> (i32, i32) {
    %c0_i32 = arith.constant 0 : i32
    %c0_i32_0 = arith.constant 0 : i32
    %c0_i32_1 = arith.constant 0 : i32
    return %c0_i32, %c0_i32_0 : i32, i32
  }
  func.func @transform_3(%arg0: i32) -> (i32, i32) {
    %c0_i32 = arith.constant 0 : i32
    %c0_i32_0 = arith.constant 0 : i32
    %c0_i32_1 = arith.constant 0 : i32
    return %c0_i32, %c0_i32_0 : i32, i32
  }
  func.func @transform_4(%arg0: i32) -> (i32, i32) {
    %c0_i32 = arith.constant 0 : i32
    %c0_i32_0 = arith.constant 0 : i32
    return %c0_i32, %arg0 : i32, i32
  }
}

module attributes {stable_mosaic.version = 11 : i64} {
  func.func @_layer_kernel(%arg0: i32, %arg1: memref<32x512xf32, #tpu.memory_space<vmem>>, %arg2: memref<32x512xf32, #tpu.memory_space<vmem>>, %arg3: memref<32x32xf32, #tpu.memory_space<vmem>>, %arg4: memref<32x1xf32, #tpu.memory_space<vmem>>, %arg5: memref<32x512xf32, #tpu.memory_space<vmem>>) attributes {dimension_semantics = [#tpu.dimension_semantics<parallel>], iteration_bounds = array<i64: 1>, scalar_prefetch = 0 : i64, scratch_operands = 0 : i64, tpu.core_type = #tpu.core_type<tc>, window_params = [{transform_indices = @transform_0, window_bounds = array<i64: 32, 512>}, {transform_indices = @transform_1, window_bounds = array<i64: 32, 512>}, {pipeline_mode = #tpu.pipeline_mode<synchronous>, transform_indices = @transform_2, window_bounds = array<i64: 32, 32>}, {pipeline_mode = #tpu.pipeline_mode<synchronous>, transform_indices = @transform_3, window_bounds = array<i64: 32, 1>}, {transform_indices = @transform_4, window_bounds = array<i64: 32, 512>}]} {
    %c0 = arith.constant 0 : index
    %c0_0 = arith.constant 0 : index
    %0 = vector.load %arg2[%c0, %c0_0] : memref<32x512xf32, #tpu.memory_space<vmem>>, vector<32x512xf32>
    %1 = arith.truncf %0 : vector<32x512xf32> to vector<32x512xbf16>
    %c0_1 = arith.constant 0 : index
    %c0_2 = arith.constant 0 : index
    %2 = vector.load %arg3[%c0_1, %c0_2] : memref<32x32xf32, #tpu.memory_space<vmem>>, vector<32x32xf32>
    %3 = arith.truncf %2 : vector<32x32xf32> to vector<32x32xbf16>
    %cst = arith.constant dense<0.000000e+00> : vector<32x512xf32>
    %4 = tpu.matmul %3, %1, %cst {dimension_numbers = #tpu.dot_dimension_numbers<[1], [0], [0], [1], [0, 0, 1, 1], [], []>} : vector<32x32xbf16>, vector<32x512xbf16>, vector<32x512xf32> -> vector<32x512xf32>
    %c0_3 = arith.constant 0 : index
    %c0_4 = arith.constant 0 : index
    %5 = vector.load %arg4[%c0_3, %c0_4] : memref<32x1xf32, #tpu.memory_space<vmem>>, vector<32x1xf32>
    %6 = vector.broadcast %5 : vector<32x1xf32> to vector<32x512xf32>
    %7 = arith.addf %4, %6 : vector<32x512xf32>
    %c0_5 = arith.constant 0 : index
    %c0_6 = arith.constant 0 : index
    %8 = vector.load %arg1[%c0_5, %c0_6] : memref<32x512xf32, #tpu.memory_space<vmem>>, vector<32x512xf32>
    %9 = arith.addf %7, %8 : vector<32x512xf32>
    %c0_7 = arith.constant 0 : index
    %c0_8 = arith.constant 0 : index
    %10 = vector.load %arg5[%c0_7, %c0_8] : memref<32x512xf32, #tpu.memory_space<vmem>>, vector<32x512xf32>
    tpu.vector_store %arg5[%c0_7, %c0_8], %9 {strides = array<i32>} : memref<32x512xf32, #tpu.memory_space<vmem>>, vector<32x512xf32>,
    return
  }
  func.func @transform_0(%arg0: i32) -> (i32, i32) {
    %c0_i32 = arith.constant 0 : i32
    %c0_i32_0 = arith.constant 0 : i32
    return %c0_i32, %arg0 : i32, i32
  }
  func.func @transform_1(%arg0: i32) -> (i32, i32) {
    %c0_i32 = arith.constant 0 : i32
    %c0_i32_0 = arith.constant 0 : i32
    return %c0_i32, %arg0 : i32, i32
  }
  func.func @transform_2(%arg0: i32) -> (i32, i32) {
    %c0_i32 = arith.constant 0 : i32
    %c0_i32_0 = arith.constant 0 : i32
    %c0_i32_1 = arith.constant 0 : i32
    return %c0_i32, %c0_i32_0 : i32, i32
  }
  func.func @transform_3(%arg0: i32) -> (i32, i32) {
    %c0_i32 = arith.constant 0 : i32
    %c0_i32_0 = arith.constant 0 : i32
    %c0_i32_1 = arith.constant 0 : i32
    return %c0_i32, %c0_i32_0 : i32, i32
  }
  func.func @transform_4(%arg0: i32) -> (i32, i32) {
    %c0_i32 = arith.constant 0 : i32
    %c0_i32_0 = arith.constant 0 : i32
    return %c0_i32, %arg0 : i32, i32
  }
}

module attributes {stable_mosaic.version = 11 : i64} {
  func.func @_proj_kernel(%arg0: i32, %arg1: memref<32x512xf32, #tpu.memory_space<vmem>>, %arg2: memref<32x32xf32, #tpu.memory_space<vmem>>, %arg3: memref<32x1xf32, #tpu.memory_space<vmem>>, %arg4: memref<1x32xf32, #tpu.memory_space<vmem>>, %arg5: memref<1x1xf32, #tpu.memory_space<vmem>>, %arg6: memref<1x512xf32, #tpu.memory_space<vmem>>) attributes {dimension_semantics = [#tpu.dimension_semantics<parallel>], iteration_bounds = array<i64: 1>, scalar_prefetch = 0 : i64, scratch_operands = 0 : i64, tpu.core_type = #tpu.core_type<tc>, window_params = [{transform_indices = @transform_0, window_bounds = array<i64: 32, 512>}, {pipeline_mode = #tpu.pipeline_mode<synchronous>, transform_indices = @transform_1, window_bounds = array<i64: 32, 32>}, {pipeline_mode = #tpu.pipeline_mode<synchronous>, transform_indices = @transform_2, window_bounds = array<i64: 32, 1>}, {pipeline_mode = #tpu.pipeline_mode<synchronous>, transform_indices = @transform_3, window_bounds = array<i64: 1, 32>}, {pipeline_mode = #tpu.pipeline_mode<synchronous>, transform_indices = @transform_4, window_bounds = array<i64: 1, 1>}, {transform_indices = @transform_5, window_bounds = array<i64: 1, 512>}]} {
    %c0 = arith.constant 0 : index
    %c0_0 = arith.constant 0 : index
    %0 = vector.load %arg1[%c0, %c0_0] : memref<32x512xf32, #tpu.memory_space<vmem>>, vector<32x512xf32>
    %1 = arith.truncf %0 : vector<32x512xf32> to vector<32x512xbf16>
    %c0_1 = arith.constant 0 : index
    %c0_2 = arith.constant 0 : index
    %2 = vector.load %arg2[%c0_1, %c0_2] : memref<32x32xf32, #tpu.memory_space<vmem>>, vector<32x32xf32>
    %3 = arith.truncf %2 : vector<32x32xf32> to vector<32x32xbf16>
    %cst = arith.constant dense<0.000000e+00> : vector<32x512xf32>
    %4 = tpu.matmul %3, %1, %cst {dimension_numbers = #tpu.dot_dimension_numbers<[1], [0], [0], [1], [0, 0, 1, 1], [], []>} : vector<32x32xbf16>, vector<32x512xbf16>, vector<32x512xf32> -> vector<32x512xf32>
    %c0_3 = arith.constant 0 : index
    %c0_4 = arith.constant 0 : index
    %5 = vector.load %arg3[%c0_3, %c0_4] : memref<32x1xf32, #tpu.memory_space<vmem>>, vector<32x1xf32>
    %6 = vector.broadcast %5 : vector<32x1xf32> to vector<32x512xf32>
    %7 = arith.addf %4, %6 : vector<32x512xf32>
    %cst_5 = arith.constant 5.000000e-01 : f32
    %8 = vector.broadcast %cst_5 : f32 to vector<32x512xf32>
    %9 = arith.mulf %8, %7 : vector<32x512xf32>
    %cst_6 = arith.constant 4.471500e-02 : f32
    %10 = vector.broadcast %cst_6 : f32 to vector<32x512xf32>
    %11 = arith.mulf %10, %7 : vector<32x512xf32>
    %12 = arith.mulf %11, %7 : vector<32x512xf32>
    %13 = arith.mulf %12, %7 : vector<32x512xf32>
    %14 = arith.addf %7, %13 : vector<32x512xf32>
    %cst_7 = arith.constant 0.797884583 : f32
    %15 = vector.broadcast %cst_7 : f32 to vector<32x512xf32>
    %16 = arith.mulf %15, %14 : vector<32x512xf32>
    %17 = math.tanh %16 : vector<32x512xf32>
    %cst_8 = arith.constant 1.000000e+00 : f32
    %18 = vector.broadcast %cst_8 : f32 to vector<32x512xf32>
    %19 = arith.addf %18, %17 : vector<32x512xf32>
    %20 = arith.mulf %9, %19 : vector<32x512xf32>
    %c0_9 = arith.constant 0 : index
    %c0_10 = arith.constant 0 : index
    %21 = vector.load %arg4[%c0_9, %c0_10] : memref<1x32xf32, #tpu.memory_space<vmem>>, vector<1x32xf32>
    %22 = arith.truncf %21 : vector<1x32xf32> to vector<1x32xbf16>
    %23 = arith.truncf %20 : vector<32x512xf32> to vector<32x512xbf16>
    %cst_11 = arith.constant dense<0.000000e+00> : vector<1x512xf32>
    %24 = tpu.matmul %22, %23, %cst_11 {dimension_numbers = #tpu.dot_dimension_numbers<[1], [0], [0], [1], [0, 0, 1, 1], [], []>} : vector<1x32xbf16>, vector<32x512xbf16>, vector<1x512xf32> -> vector<1x512xf32>
    %c0_12 = arith.constant 0 : index
    %c0_13 = arith.constant 0 : index
    %25 = vector.load %arg5[%c0_12, %c0_13] : memref<1x1xf32, #tpu.memory_space<vmem>>, vector<1x1xf32>
    %26 = vector.broadcast %25 : vector<1x1xf32> to vector<1x512xf32>
    %27 = arith.addf %24, %26 : vector<1x512xf32>
    %c0_14 = arith.constant 0 : index
    %c0_15 = arith.constant 0 : index
    %28 = vector.load %arg6[%c0_14, %c0_15] : memref<1x512xf32, #tpu.memory_space<vmem>>, vector<1x512xf32>
    tpu.vector_store %arg6[%c0_14, %c0_15], %27 {strides = array<i32>} : memref<1x512xf32, #tpu.memory_space<vmem>>, vector<1x512xf32>,
    return
  }
  func.func @transform_0(%arg0: i32) -> (i32, i32) {
    %c0_i32 = arith.constant 0 : i32
    %c0_i32_0 = arith.constant 0 : i32
    return %c0_i32, %arg0 : i32, i32
  }
  func.func @transform_1(%arg0: i32) -> (i32, i32) {
    %c0_i32 = arith.constant 0 : i32
    %c0_i32_0 = arith.constant 0 : i32
    %c0_i32_1 = arith.constant 0 : i32
    return %c0_i32, %c0_i32_0 : i32, i32
  }
  func.func @transform_2(%arg0: i32) -> (i32, i32) {
    %c0_i32 = arith.constant 0 : i32
    %c0_i32_0 = arith.constant 0 : i32
    %c0_i32_1 = arith.constant 0 : i32
    return %c0_i32, %c0_i32_0 : i32, i32
  }
  func.func @transform_3(%arg0: i32) -> (i32, i32) {
    %c0_i32 = arith.constant 0 : i32
    %c0_i32_0 = arith.constant 0 : i32
    %c0_i32_1 = arith.constant 0 : i32
    return %c0_i32, %c0_i32_0 : i32, i32
  }
  func.func @transform_4(%arg0: i32) -> (i32, i32) {
    %c0_i32 = arith.constant 0 : i32
    %c0_i32_0 = arith.constant 0 : i32
    %c0_i32_1 = arith.constant 0 : i32
    return %c0_i32, %c0_i32_0 : i32, i32
  }
  func.func @transform_5(%arg0: i32) -> (i32, i32) {
    %c0_i32 = arith.constant 0 : i32
    %c0_i32_0 = arith.constant 0 : i32
    return %c0_i32, %arg0 : i32, i32
  }
}

</mosaic_0001>

<bundles_post_ra>
// kernel: fno_forward_pallas.8
= control target key start
LH: loop header
LB: loop body
LE: loop exit
PB: predicated region body
PF: predicated region fallthrough
CT: control target
= control target key end

     0   :  { %vm61_vm0 = vcmask 1042432   ;;  %v286_v2 = vmov 0.0   ;;  %v287_v5 = vmov 0   ;;  %vm48_vm1 = vcmask 23552   ;;  %s398_s0 = inlined_call_operand.vmem [shape: f32[3,512], index: 0, kind: input, shape index: {}]   ;;  %s399_s1 = inlined_call_operand.vmem [shape: f32[32,3], index: 1, kind: input, shape index: {}]   ;;  %s400_s2 = inlined_call_operand.vmem [shape: f32[32,1], index: 2, kind: input, shape index: {}]   ;;  %s401_s3 = inlined_call_operand.vmem [shape: f32[32,512], index: 3, kind: output, shape index: {}]  }
   0x1   :  { %v18_v0 = vld [vmem:[%s398_s0] sm:$0x77]  ;;  %v19_v1 = vld [vmem:[%s398_s0 + $0x8] sm:$0x77]  ;;  %134 = vmatprep.mubr.f32.mxu0 %v286_v2  ;;  %223 = vmatprep.mubr.f32.mxu1 %v286_v2  ;;  %v22_v8 = vld [vmem:[%s400_s2 + $0x10] sm:$0xff] }
   0x2   :  { %v46_v3 = vcombine.high %v18_v0, %v18_v0  ;;  %v47_v4 = vcombine.high %v19_v1, %v19_v1  ;;  %282 = vset.pattern.permute.xlu0 %v287_v5  ;;  %283 = vset.pattern.permute.xlu1 %v287_v5  ;;  %v14_v6 = vld [vmem:[%s399_s1] sm:$0xff]  ;;  %v15_v9 = vld [vmem:[%s399_s1 + $0x8] sm:$0xff]  ;;  %v23_v11 = vld [vmem:[%s400_s2 + $0x18] sm:$0xff] }
   0x3   :  { %v20_v7 = vld [vmem:[%s400_s2] sm:$0xff]  ;;  %36 = vperm.xlu1 %283, %v22_v8   ;;  %v21_v10 = vld [vmem:[%s400_s2 + $0x8] sm:$0xff]  ;;  %v16_v12 = vld [vmem:[%s399_s1 + $0x10] sm:$0xff] }
   0x4   :  { %268 = vmatprep.subr.msk.mxu0 %vm61_vm0, %v46_v3  ;;  %274 = vmatprep.subr.msk.mxu1 %vm61_vm0, %v47_v4  ;;  %v17_v13 = vld [vmem:[%s399_s1 + $0x18] sm:$0xff] }
   0x5   :  { %269 = vmatpush1.msk.msra.mxu0 %vm61_vm0, %v18_v0  ;;  %275 = vmatpush1.msk.msra.mxu1 %vm61_vm0, %v19_v1 }
   0x6   :  { %270 = vmatmul.mubr.msk.f32.vlgmr.msra.gmra.mrb[0].mxu0 %vm48_vm1, %v14_v6  ;;  %276 = vmatmul.mubr.msk.f32.vlgmr.msra.gmra.mrb[0].mxu1 %vm48_vm1, %v14_v6 }
   0x7   :  { %140 = vmatprep.mubr.f32.mxu0 %v286_v2  ;;  %229 = vmatprep.mubr.f32.mxu1 %v286_v2 }
   0x8   :  { %26 = vperm.xlu0 %282, %v20_v7   ;;  %41 = vperm.xlu1 %283, %v23_v11  }
   0xa   :  { %271 = vmatmul.mubr.msk.f32.gmra.mrb[2].mxu0 %vm48_vm1, %v15_v9  ;;  %277 = vmatmul.mubr.msk.f32.gmra.mrb[2].mxu1 %vm48_vm1, %v15_v9 }
   0xb   :  { %146 = vmatprep.mubr.f32.mxu0 %v286_v2  ;;  %235 = vmatprep.mubr.f32.mxu1 %v286_v2 }
   0xc   :  { %31 = vperm.xlu0 %282, %v21_v10  }
   0xe   :  { %272 = vmatmul.mubr.msk.f32.gmra.mrb[4].mxu0 %vm48_vm1, %v16_v12  ;;  %278 = vmatmul.mubr.msk.f32.gmra.mrb[4].mxu1 %vm48_vm1, %v16_v12 }
   0xf   :  { %152 = vmatprep.mubr.f32.mxu0 %v286_v2  ;;  %241 = vmatprep.mubr.f32.mxu1 %v286_v2 }
  0x12   :  { %273 = vmatmul.mubr.msk.f32.gmra.mrb[6].mxu0 %vm48_vm1, %v17_v13  ;;  %279 = vmatmul.mubr.msk.f32.gmra.mrb[6].mxu1 %vm48_vm1, %v17_v13 }
  0x82   :  { %v37_v24 = vpop.permute.xlu1 %36 }
  0x87   :  { %v27_v14 = vpop.permute.xlu0 %26  ;;  %v42_v41 = vpop.permute.xlu1 %41 }
  0x8b   :  { %v32_v23 = vpop.permute.xlu0 %31 }
  0xd9   :  { %v136_v15 = vpop.f32.mrb[0].mxu0  ;;  %v225_v16 = vpop.f32.mrb[0].mxu1 }
  0xda   :  { %v137_v17 = vadd.f32 %v136_v15, %v27_v14  ;;  %v226_v18 = vadd.f32 %v225_v16, %v27_v14  ;;  %v138_v19 = vpop.f32.mrb[1].mxu0  ;;  %v227_v20 = vpop.f32.mrb[1].mxu1 }
  0xdb   :  { %v139_v21 = vadd.f32 %v138_v19, %v27_v14  ;;  %v228_v22 = vadd.f32 %v227_v20, %v27_v14 }
  0xdc   :  { %248 = vst [vmem:[%s401_s3] sm:$0xff] %v137_v17  ;;  %250 = vst [vmem:[%s401_s3 + $0x10] sm:$0xff] %v226_v18 }
  0xdd   :  { %249 = vst [vmem:[%s401_s3 + $0x8] sm:$0xff] %v139_v21  ;;  %251 = vst [vmem:[%s401_s3 + $0x18] sm:$0xff] %v228_v22  ;;  %v142_v25 = vpop.f32.mrb[2].mxu0  ;;  %v231_v26 = vpop.f32.mrb[2].mxu1 }
  0xde   :  { %v143_v27 = vadd.f32 %v142_v25, %v32_v23  ;;  %v232_v28 = vadd.f32 %v231_v26, %v32_v23  ;;  %v144_v29 = vpop.f32.mrb[3].mxu0  ;;  %v233_v30 = vpop.f32.mrb[3].mxu1 }
  0xdf   :  { %v145_v31 = vadd.f32 %v144_v29, %v32_v23  ;;  %v234_v32 = vadd.f32 %v233_v30, %v32_v23 }
  0xe0   :  { %252 = vst [vmem:[%s401_s3 + $0x20] sm:$0xff] %v143_v27  ;;  %254 = vst [vmem:[%s401_s3 + $0x30] sm:$0xff] %v232_v28 }
  0xe1   :  { %253 = vst [vmem:[%s401_s3 + $0x28] sm:$0xff] %v145_v31  ;;  %255 = vst [vmem:[%s401_s3 + $0x38] sm:$0xff] %v234_v32  ;;  %v148_v33 = vpop.f32.mrb[4].mxu0  ;;  %v237_v34 = vpop.f32.mrb[4].mxu1 }
  0xe2   :  { %v149_v35 = vadd.f32 %v148_v33, %v37_v24  ;;  %v238_v36 = vadd.f32 %v237_v34, %v37_v24  ;;  %v150_v37 = vpop.f32.mrb[5].mxu0  ;;  %v239_v38 = vpop.f32.mrb[5].mxu1 }
  0xe3   :  { %v151_v39 = vadd.f32 %v150_v37, %v37_v24  ;;  %v240_v40 = vadd.f32 %v239_v38, %v37_v24 }
  0xe4   :  { %256 = vst [vmem:[%s401_s3 + $0x40] sm:$0xff] %v149_v35  ;;  %258 = vst [vmem:[%s401_s3 + $0x50] sm:$0xff] %v238_v36 }
  0xe5   :  { %257 = vst [vmem:[%s401_s3 + $0x48] sm:$0xff] %v151_v39  ;;  %259 = vst [vmem:[%s401_s3 + $0x58] sm:$0xff] %v240_v40  ;;  %v154_v42 = vpop.f32.mrb[6].mxu0  ;;  %v243_v43 = vpop.f32.mrb[6].mxu1 }
  0xe6   :  { %v155_v44 = vadd.f32 %v154_v42, %v42_v41  ;;  %v244_v45 = vadd.f32 %v243_v43, %v42_v41  ;;  %v156_v46 = vpop.f32.mrb[7].mxu0  ;;  %v245_v47 = vpop.f32.mrb[7].mxu1 }
  0xe7   :  { %v157_v48 = vadd.f32 %v156_v46, %v42_v41  ;;  %v246_v49 = vadd.f32 %v245_v47, %v42_v41 }
  0xe8   :  { %260 = vst [vmem:[%s401_s3 + $0x60] sm:$0xff] %v155_v44  ;;  %262 = vst [vmem:[%s401_s3 + $0x70] sm:$0xff] %v244_v45 }
  0xe9   :  { %261 = vst [vmem:[%s401_s3 + $0x68] sm:$0xff] %v157_v48  ;;  %263 = vst [vmem:[%s401_s3 + $0x78] sm:$0xff] %v246_v49 }

// kernel: fno_forward_pallas.9
= control target key start
LH: loop header
LB: loop body
LE: loop exit
PB: predicated region body
PF: predicated region fallthrough
CT: control target
= control target key end

     0   :  { %v3316_v0 = vmov 0.0   ;;  %vm3317_vm0 = vmmov 0   ;;  %vm324_vm1 = vcmask 523264   ;;  %vm2445_vm2 = vcmask 517120   ;;  %s4165_s1 = inlined_call_operand.vmem [shape: bf16[32,64,64], index: 1, kind: input, shape index: {}]   ;;  %s4166_s0 = inlined_call_operand.vmem [shape: bf16[32,2,64], index: 0, kind: input, shape index: {}]   ;;  %s4167_s2 = inlined_call_operand.vmem [shape: f32[32,2,64], index: 2, kind: output, shape index: {}]  }
   0x1   :  { %2802 = vmatprep.subr.bf16.mxu0 %v3316_v0  ;;  %2814 = vmatprep.subr.bf16.mxu1 %v3316_v0  ;;  %v3188_v1 = vld [vmem:[%s4165_s1] sm:$0xff]   ;;  %v3190_v3 = vld [vmem:[%s4165_s1 + $0x8] sm:$0xff]   ;;  %v3192_v5 = vld [vmem:[%s4165_s1 + $0x10] sm:$0xff]  }
   0x2   :  { %v3189_v2 = vld [vmem:[%s4165_s1 + $0x20] sm:$0xff]   ;;  %2810 = vmatprep.mubr.msk.bf16.mxu0 %vm3317_vm0, %v3316_v0  ;;  %2822 = vmatprep.mubr.msk.bf16.mxu1 %vm3317_vm0, %v3316_v0  ;;  %v3191_v4 = vld [vmem:[%s4165_s1 + $0x28] sm:$0xff]   ;;  %v3193_v6 = vld [vmem:[%s4165_s1 + $0x30] sm:$0xff]  }
   0x3   :  { %2803 = vmatpush3.bf16.msra.mxu0 %v3188_v1  ;;  %2815 = vmatpush3.bf16.msra.mxu1 %v3189_v2  ;;  %v3194_v7 = vld [vmem:[%s4165_s1 + $0x18] sm:$0xff]   ;;  %v12_v9 = vld [vmem:[%s4166_s0] sm:$0x1]  ;;  %v13_v10 = vld [vmem:[%s4166_s0 + $0x1] sm:$0x1] }
   0x4   :  { %2804 = vmatprep.subr.bf16.mxu0 %v3316_v0  ;;  %2816 = vmatprep.subr.bf16.mxu1 %v3316_v0  ;;  %v3195_v8 = vld [vmem:[%s4165_s1 + $0x38] sm:$0xff]   ;;  %v3196_v11 = vld [vmem:[%s4165_s1 + $0x40] sm:$0xff]   ;;  %v3198_v13 = vld [vmem:[%s4165_s1 + $0x48] sm:$0xff]  }
   0x5   :  { %v3197_v12 = vld [vmem:[%s4165_s1 + $0x60] sm:$0xff]   ;;  %v3199_v14 = vld [vmem:[%s4165_s1 + $0x68] sm:$0xff]   ;;  %v3200_v15 = vld [vmem:[%s4165_s1 + $0x50] sm:$0xff]  }
   0x6   :  { %v3201_v16 = vld [vmem:[%s4165_s1 + $0x70] sm:$0xff]   ;;  %v3202_v17 = vld [vmem:[%s4165_s1 + $0x58] sm:$0xff]   ;;  %v14_v19 = vld [vmem:[%s4166_s0 + $0x2] sm:$0x1] }
   0x7   :  { %2805 = vmatpush3.bf16.msra.mxu0 %v3190_v3  ;;  %2817 = vmatpush3.bf16.msra.mxu1 %v3191_v4  ;;  %v3203_v18 = vld [vmem:[%s4165_s1 + $0x78] sm:$0xff]   ;;  %v15_v20 = vld [vmem:[%s4166_s0 + $0x3] sm:$0x1]  ;;  %v3206_v23 = vld [vmem:[%s4165_s1 + $0x88] sm:$0xff]  }
   0x8   :  { %2806 = vmatprep.subr.bf16.mxu0 %v3316_v0  ;;  %2818 = vmatprep.subr.bf16.mxu1 %v3316_v0  ;;  %v3204_v21 = vld [vmem:[%s4165_s1 + $0x80] sm:$0xff]   ;;  %v3207_v24 = vld [vmem:[%s4165_s1 + $0xa8] sm:$0xff]   ;;  %v3208_v25 = vld [vmem:[%s4165_s1 + $0x90] sm:$0xff]  }
   0x9   :  { %v3205_v22 = vld [vmem:[%s4165_s1 + $0xa0] sm:$0xff]   ;;  %v3209_v26 = vld [vmem:[%s4165_s1 + $0xb0] sm:$0xff]   ;;  %v3210_v27 = vld [vmem:[%s4165_s1 + $0x98] sm:$0xff]  }
   0xa   :  { %v3211_v28 = vld [vmem:[%s4165_s1 + $0xb8] sm:$0xff]   ;;  %v16_v29 = vld [vmem:[%s4166_s0 + $0x4] sm:$0x1]  ;;  %v17_v30 = vld [vmem:[%s4166_s0 + $0x5] sm:$0x1] }
   0xb   :  { %2807 = vmatpush3.bf16.msra.mxu0 %v3192_v5  ;;  %2819 = vmatpush3.bf16.msra.mxu1 %v3193_v6  ;;  %v3212_v31 = vld [vmem:[%s4165_s1 + $0xc0] sm:$0xff]   ;;  %v3214_v33 = vld [vmem:[%s4165_s1 + $0xc8] sm:$0xff]   ;;  %v3216_v35 = vld [vmem:[%s4165_s1 + $0xd0] sm:$0xff]  }
   0xc   :  { %2808 = vmatprep.subr.bf16.mxu0 %v3316_v0  ;;  %2820 = vmatprep.subr.bf16.mxu1 %v3316_v0  ;;  %v3213_v32 = vld [vmem:[%s4165_s1 + $0xe0] sm:$0xff]   ;;  %v3215_v34 = vld [vmem:[%s4165_s1 + $0xe8] sm:$0xff]   ;;  %v3217_v36 = vld [vmem:[%s4165_s1 + $0xf0] sm:$0xff]  }
   0xd   :  { %v3218_v37 = vld [vmem:[%s4165_s1 + $0xd8] sm:$0xff]   ;;  %v18_v39 = vld [vmem:[%s4166_s0 + $0x6] sm:$0x1]  ;;  %v19_v40 = vld [vmem:[%s4166_s0 + $0x7] sm:$0x1] }
   0xe   :  { %v3219_v38 = vld [vmem:[%s4165_s1 + $0xf8] sm:$0xff]   ;;  %v3220_v41 = vld [vmem:[%s4165_s1 + $0x100] sm:$0xff]   ;;  %v3222_v43 = vld [vmem:[%s4165_s1 + $0x108] sm:$0xff]  }
   0xf   :  { %2809 = vmatpush3.bf16.msra.mxu0 %v3194_v7  ;;  %2821 = vmatpush3.bf16.msra.mxu1 %v3195_v8  ;;  %v3221_v42 = vld [vmem:[%s4165_s1 + $0x120] sm:$0xff]   ;;  %v3223_v44 = vld [vmem:[%s4165_s1 + $0x128] sm:$0xff]   ;;  %v3224_v45 = vld [vmem:[%s4165_s1 + $0x110] sm:$0xff]  }
  0x10   :  { %2826 = vmatprep.subr.bf16.mxu0 %v3316_v0  ;;  %2838 = vmatprep.subr.bf16.mxu1 %v3316_v0  ;;  %v3225_v46 = vld [vmem:[%s4165_s1 + $0x130] sm:$0xff]   ;;  %v3226_v47 = vld [vmem:[%s4165_s1 + $0x118] sm:$0xff]   ;;  %v20_v49 = vld [vmem:[%s4166_s0 + $0x8] sm:$0x1] }
  0x11   :  { %v3227_v48 = vld [vmem:[%s4165_s1 + $0x138] sm:$0xff]   ;;  %v21_v50 = vld [vmem:[%s4166_s0 + $0x9] sm:$0x1]  ;;  %v3228_v51 = vld [vmem:[%s4165_s1 + $0x140] sm:$0xff]  }
  0x12   :  { %2811 = vmatmul.mubr.msk.bf16.vlgmr.msra.gmra.mrb[0].mxu0 %vm324_vm1, %v12_v9  ;;  %2823 = vmatmul.mubr.msk.bf16.vlgmr.msra.gmra.mrb[0].mxu1 %vm324_vm1, %v13_v10  ;;  %v3229_v52 = vld [vmem:[%s4165_s1 + $0x160] sm:$0xff]   ;;  %v3230_v53 = vld [vmem:[%s4165_s1 + $0x148] sm:$0xff]   ;;  %v3232_v55 = vld [vmem:[%s4165_s1 + $0x150] sm:$0xff]  }
  0x13   :  { %2827 = vmatpush3.bf16.msra.mxu0 %v3196_v11  ;;  %2839 = vmatpush3.bf16.msra.mxu1 %v3197_v12  ;;  %v3231_v54 = vld [vmem:[%s4165_s1 + $0x168] sm:$0xff]   ;;  %v3233_v56 = vld [vmem:[%s4165_s1 + $0x170] sm:$0xff]   ;;  %v3234_v57 = vld [vmem:[%s4165_s1 + $0x158] sm:$0xff]  }
  0x14   :  { %2828 = vmatprep.subr.bf16.mxu0 %v3316_v0  ;;  %2840 = vmatprep.subr.bf16.mxu1 %v3316_v0  ;;  %v3235_v58 = vld [vmem:[%s4165_s1 + $0x178] sm:$0xff]   ;;  %v22_v59 = vld [vmem:[%s4166_s0 + $0xa] sm:$0x1]  ;;  %v23_v60 = vld [vmem:[%s4166_s0 + $0xb] sm:$0x1] }
  0x15   :  { %2834 = vmatprep.mubr.msk.bf16.mxu0 %vm3317_vm0, %v3316_v0  ;;  %2846 = vmatprep.mubr.msk.bf16.mxu1 %vm3317_vm0, %v3316_v0  ;;  %v3236_v61 = vld [vmem:[%s4165_s1 + $0x180] sm:$0xff]   ;;  %v3238_v63 = vld [vmem:[%s4165_s1 + $0x188] sm:$0xff]   ;;  %v3240_v2 = vld [vmem:[%s4165_s1 + $0x190] sm:$0xff]  }
  0x16   :  { %v3237_v62 = vld [vmem:[%s4165_s1 + $0x1a0] sm:$0xff]   ;;  %v3239_v1 = vld [vmem:[%s4165_s1 + $0x1a8] sm:$0xff]   ;;  %v3241_v3 = vld [vmem:[%s4165_s1 + $0x1b0] sm:$0xff]  }
  0x17   :  { %2829 = vmatpush3.bf16.msra.mxu0 %v3198_v13  ;;  %2841 = vmatpush3.bf16.msra.mxu1 %v3199_v14  ;;  %v3242_v4 = vld [vmem:[%s4165_s1 + $0x198] sm:$0xff]   ;;  %v24_v6 = vld [vmem:[%s4166_s0 + $0xc] sm:$0x1]  ;;  %v25_v7 = vld [vmem:[%s4166_s0 + $0xd] sm:$0x1] }
  0x18   :  { %2830 = vmatprep.subr.bf16.mxu0 %v3316_v0  ;;  %2842 = vmatprep.subr.bf16.mxu1 %v3316_v0  ;;  %v3243_v5 = vld [vmem:[%s4165_s1 + $0x1b8] sm:$0xff]   ;;  %v3244_v8 = vld [vmem:[%s4165_s1 + $0x1c0] sm:$0xff]   ;;  %v3246_v10 = vld [vmem:[%s4165_s1 + $0x1c8] sm:$0xff]  }
  0x19   :  { %v3245_v9 = vld [vmem:[%s4165_s1 + $0x1e0] sm:$0xff]   ;;  %v3247_v11 = vld [vmem:[%s4165_s1 + $0x1e8] sm:$0xff]   ;;  %v3248_v12 = vld [vmem:[%s4165_s1 + $0x1d0] sm:$0xff]  }
  0x1a   :  { %v3249_v13 = vld [vmem:[%s4165_s1 + $0x1f0] sm:$0xff]   ;;  %v3250_v14 = vld [vmem:[%s4165_s1 + $0x1d8] sm:$0xff]  }
  0x1b   :  { %2831 = vmatpush3.bf16.msra.mxu0 %v3200_v15  ;;  %2843 = vmatpush3.bf16.msra.mxu1 %v3201_v16  ;;  %v3251_v15 = vld [vmem:[%s4165_s1 + $0x1f8] sm:$0xff]   ;;  %v26_v16 = vld [vmem:[%s4166_s0 + $0xe] sm:$0x1] }
  0x1c   :  { %2832 = vmatprep.subr.bf16.mxu0 %v3316_v0  ;;  %2844 = vmatprep.subr.bf16.mxu1 %v3316_v0 }
  0x1f   :  { %2833 = vmatpush3.bf16.msra.mxu0 %v3202_v17  ;;  %2845 = vmatpush3.bf16.msra.mxu1 %v3203_v18  ;;  %v27_v17 = vld [vmem:[%s4166_s0 + $0xf] sm:$0x1]  ;;  %v3252_v18 = vld [vmem:[%s4165_s1 + $0x200] sm:$0xff]  }
  0x20   :  { %2850 = vmatprep.subr.bf16.mxu0 %v3316_v0  ;;  %2862 = vmatprep.subr.bf16.mxu1 %v3316_v0 }
  0x22   :  { %2835 = vmatmul.mubr.msk.bf16.vlgmr.msra.gmra.mrb[4].mxu0 %vm324_vm1, %v14_v19  ;;  %2847 = vmatmul.mubr.msk.bf16.vlgmr.msra.gmra.mrb[4].mxu1 %vm324_vm1, %v15_v20  ;;  %v3253_v19 = vld [vmem:[%s4165_s1 + $0x220] sm:$0xff]   ;;  %v3254_v20 = vld [vmem:[%s4165_s1 + $0x208] sm:$0xff]  }
  0x23   :  { %2851 = vmatpush3.bf16.msra.mxu0 %v3204_v21  ;;  %2863 = vmatpush3.bf16.msra.mxu1 %v3205_v22  ;;  %v3255_v21 = vld [vmem:[%s4165_s1 + $0x228] sm:$0xff]   ;;  %v3256_v22 = vld [vmem:[%s4165_s1 + $0x210] sm:$0xff]  }
  0x24   :  { %2852 = vmatprep.subr.bf16.mxu0 %v3316_v0  ;;  %2864 = vmatprep.subr.bf16.mxu1 %v3316_v0 }
  0x25   :  { %2858 = vmatprep.mubr.msk.bf16.mxu0 %vm3317_vm0, %v3316_v0  ;;  %2870 = vmatprep.mubr.msk.bf16.mxu1 %vm3317_vm0, %v3316_v0 }
  0x27   :  { %2853 = vmatpush3.bf16.msra.mxu0 %v3206_v23  ;;  %2865 = vmatpush3.bf16.msra.mxu1 %v3207_v24  ;;  %v3257_v23 = vld [vmem:[%s4165_s1 + $0x230] sm:$0xff]   ;;  %v3258_v24 = vld [vmem:[%s4165_s1 + $0x218] sm:$0xff]  }
  0x28   :  { %2854 = vmatprep.subr.bf16.mxu0 %v3316_v0  ;;  %2866 = vmatprep.subr.bf16.mxu1 %v3316_v0 }
  0x2b   :  { %2855 = vmatpush3.bf16.msra.mxu0 %v3208_v25  ;;  %2867 = vmatpush3.bf16.msra.mxu1 %v3209_v26  ;;  %v3259_v25 = vld [vmem:[%s4165_s1 + $0x238] sm:$0xff]   ;;  %v28_v26 = vld [vmem:[%s4166_s0 + $0x10] sm:$0x1] }
  0x2c   :  { %2856 = vmatprep.subr.bf16.mxu0 %v3316_v0  ;;  %2868 = vmatprep.subr.bf16.mxu1 %v3316_v0 }
  0x2f   :  { %2857 = vmatpush3.bf16.msra.mxu0 %v3210_v27  ;;  %2869 = vmatpush3.bf16.msra.mxu1 %v3211_v28  ;;  %v3260_v27 = vld [vmem:[%s4165_s1 + $0x240] sm:$0xff]   ;;  %v29_v28 = vld [vmem:[%s4166_s0 + $0x11] sm:$0x1] }
  0x30   :  { %2874 = vmatprep.subr.bf16.mxu0 %v3316_v0  ;;  %2886 = vmatprep.subr.bf16.mxu1 %v3316_v0 }
  0x32   :  { %2859 = vmatmul.mubr.msk.bf16.vlgmr.msra.gmra.mrb[8].mxu0 %vm324_vm1, %v16_v29  ;;  %2871 = vmatmul.mubr.msk.bf16.vlgmr.msra.gmra.mrb[8].mxu1 %vm324_vm1, %v17_v30  ;;  %v3261_v29 = vld [vmem:[%s4165_s1 + $0x260] sm:$0xff]   ;;  %v3262_v30 = vld [vmem:[%s4165_s1 + $0x248] sm:$0xff]  }
  0x33   :  { %2875 = vmatpush3.bf16.msra.mxu0 %v3212_v31  ;;  %2887 = vmatpush3.bf16.msra.mxu1 %v3213_v32  ;;  %v3263_v31 = vld [vmem:[%s4165_s1 + $0x268] sm:$0xff]   ;;  %v3264_v32 = vld [vmem:[%s4165_s1 + $0x250] sm:$0xff]  }
  0x34   :  { %2876 = vmatprep.subr.bf16.mxu0 %v3316_v0  ;;  %2888 = vmatprep.subr.bf16.mxu1 %v3316_v0 }
  0x35   :  { %2882 = vmatprep.mubr.msk.bf16.mxu0 %vm3317_vm0, %v3316_v0  ;;  %2894 = vmatprep.mubr.msk.bf16.mxu1 %vm3317_vm0, %v3316_v0 }
  0x37   :  { %2877 = vmatpush3.bf16.msra.mxu0 %v3214_v33  ;;  %2889 = vmatpush3.bf16.msra.mxu1 %v3215_v34  ;;  %v3265_v33 = vld [vmem:[%s4165_s1 + $0x270] sm:$0xff]   ;;  %v3266_v34 = vld [vmem:[%s4165_s1 + $0x258] sm:$0xff]  }
  0x38   :  { %2878 = vmatprep.subr.bf16.mxu0 %v3316_v0  ;;  %2890 = vmatprep.subr.bf16.mxu1 %v3316_v0 }
  0x3b   :  { %2879 = vmatpush3.bf16.msra.mxu0 %v3216_v35  ;;  %2891 = vmatpush3.bf16.msra.mxu1 %v3217_v36  ;;  %v3267_v35 = vld [vmem:[%s4165_s1 + $0x278] sm:$0xff]   ;;  %v30_v36 = vld [vmem:[%s4166_s0 + $0x12] sm:$0x1] }
  0x3c   :  { %2880 = vmatprep.subr.bf16.mxu0 %v3316_v0  ;;  %2892 = vmatprep.subr.bf16.mxu1 %v3316_v0 }
  0x3f   :  { %2881 = vmatpush3.bf16.msra.mxu0 %v3218_v37  ;;  %2893 = vmatpush3.bf16.msra.mxu1 %v3219_v38  ;;  %v3268_v37 = vld [vmem:[%s4165_s1 + $0x280] sm:$0xff]   ;;  %v31_v38 = vld [vmem:[%s4166_s0 + $0x13] sm:$0x1] }
  0x40   :  { %2898 = vmatprep.subr.bf16.mxu0 %v3316_v0  ;;  %2910 = vmatprep.subr.bf16.mxu1 %v3316_v0 }
  0x42   :  { %2883 = vmatmul.mubr.msk.bf16.vlgmr.msra.gmra.mrb[12].mxu0 %vm324_vm1, %v18_v39  ;;  %2895 = vmatmul.mubr.msk.bf16.vlgmr.msra.gmra.mrb[12].mxu1 %vm324_vm1, %v19_v40  ;;  %v3269_v39 = vld [vmem:[%s4165_s1 + $0x2a0] sm:$0xff]   ;;  %v3270_v40 = vld [vmem:[%s4165_s1 + $0x288] sm:$0xff]  }
  0x43   :  { %2899 = vmatpush3.bf16.msra.mxu0 %v3220_v41  ;;  %2911 = vmatpush3.bf16.msra.mxu1 %v3221_v42  ;;  %v3271_v41 = vld [vmem:[%s4165_s1 + $0x2a8] sm:$0xff]   ;;  %v3272_v42 = vld [vmem:[%s4165_s1 + $0x290] sm:$0xff]  }
  0x44   :  { %2900 = vmatprep.subr.bf16.mxu0 %v3316_v0  ;;  %2912 = vmatprep.subr.bf16.mxu1 %v3316_v0 }
  0x45   :  { %2906 = vmatprep.mubr.msk.bf16.mxu0 %vm3317_vm0, %v3316_v0  ;;  %2918 = vmatprep.mubr.msk.bf16.mxu1 %vm3317_vm0, %v3316_v0 }
  0x47   :  { %2901 = vmatpush3.bf16.msra.mxu0 %v3222_v43  ;;  %2913 = vmatpush3.bf16.msra.mxu1 %v3223_v44  ;;  %v3273_v43 = vld [vmem:[%s4165_s1 + $0x2b0] sm:$0xff]   ;;  %v3274_v44 = vld [vmem:[%s4165_s1 + $0x298] sm:$0xff]  }
  0x48   :  { %2902 = vmatprep.subr.bf16.mxu0 %v3316_v0  ;;  %2914 = vmatprep.subr.bf16.mxu1 %v3316_v0 }
  0x4b   :  { %2903 = vmatpush3.bf16.msra.mxu0 %v3224_v45  ;;  %2915 = vmatpush3.bf16.msra.mxu1 %v3225_v46  ;;  %v3275_v45 = vld [vmem:[%s4165_s1 + $0x2b8] sm:$0xff]   ;;  %v32_v46 = vld [vmem:[%s4166_s0 + $0x14] sm:$0x1] }
  0x4c   :  { %2904 = vmatprep.subr.bf16.mxu0 %v3316_v0  ;;  %2916 = vmatprep.subr.bf16.mxu1 %v3316_v0 }
  0x4f   :  { %2905 = vmatpush3.bf16.msra.mxu0 %v3226_v47  ;;  %2917 = vmatpush3.bf16.msra.mxu1 %v3227_v48  ;;  %v3276_v47 = vld [vmem:[%s4165_s1 + $0x2c0] sm:$0xff]   ;;  %v33_v48 = vld [vmem:[%s4166_s0 + $0x15] sm:$0x1] }
  0x50   :  { %2922 = vmatprep.subr.bf16.mxu0 %v3316_v0  ;;  %2934 = vmatprep.subr.bf16.mxu1 %v3316_v0 }
  0x52   :  { %2907 = vmatmul.mubr.msk.bf16.vlgmr.msra.gmra.mrb[16].mxu0 %vm324_vm1, %v20_v49  ;;  %2919 = vmatmul.mubr.msk.bf16.vlgmr.msra.gmra.mrb[16].mxu1 %vm324_vm1, %v21_v50  ;;  %v3277_v49 = vld [vmem:[%s4165_s1 + $0x2e0] sm:$0xff]   ;;  %v3278_v50 = vld [vmem:[%s4165_s1 + $0x2c8] sm:$0xff]  }
  0x53   :  { %2923 = vmatpush3.bf16.msra.mxu0 %v3228_v51  ;;  %2935 = vmatpush3.bf16.msra.mxu1 %v3229_v52  ;;  %v3279_v51 = vld [vmem:[%s4165_s1 + $0x2e8] sm:$0xff]   ;;  %v3280_v52 = vld [vmem:[%s4165_s1 + $0x2d0] sm:$0xff]  }
  0x54   :  { %2924 = vmatprep.subr.bf16.mxu0 %v3316_v0  ;;  %2936 = vmatprep.subr.bf16.mxu1 %v3316_v0 }
  0x55   :  { %2930 = vmatprep.mubr.msk.bf16.mxu0 %vm3317_vm0, %v3316_v0  ;;  %2942 = vmatprep.mubr.msk.bf16.mxu1 %vm3317_vm0, %v3316_v0 }
  0x57   :  { %2925 = vmatpush3.bf16.msra.mxu0 %v3230_v53  ;;  %2937 = vmatpush3.bf16.msra.mxu1 %v3231_v54  ;;  %v3281_v53 = vld [vmem:[%s4165_s1 + $0x2f0] sm:$0xff]   ;;  %v3282_v54 = vld [vmem:[%s4165_s1 + $0x2d8] sm:$0xff]  }
  0x58   :  { %2926 = vmatprep.subr.bf16.mxu0 %v3316_v0  ;;  %2938 = vmatprep.subr.bf16.mxu1 %v3316_v0 }
  0x5b   :  { %2927 = vmatpush3.bf16.msra.mxu0 %v3232_v55  ;;  %2939 = vmatpush3.bf16.msra.mxu1 %v3233_v56  ;;  %v3283_v55 = vld [vmem:[%s4165_s1 + $0x2f8] sm:$0xff]   ;;  %v34_v56 = vld [vmem:[%s4166_s0 + $0x16] sm:$0x1] }
  0x5c   :  { %2928 = vmatprep.subr.bf16.mxu0 %v3316_v0  ;;  %2940 = vmatprep.subr.bf16.mxu1 %v3316_v0 }
  0x5f   :  { %2929 = vmatpush3.bf16.msra.mxu0 %v3234_v57  ;;  %2941 = vmatpush3.bf16.msra.mxu1 %v3235_v58  ;;  %v3284_v57 = vld [vmem:[%s4165_s1 + $0x300] sm:$0xff]   ;;  %v35_v58 = vld [vmem:[%s4166_s0 + $0x17] sm:$0x1] }
  0x60   :  { %2946 = vmatprep.subr.bf16.mxu0 %v3316_v0  ;;  %2958 = vmatprep.subr.bf16.mxu1 %v3316_v0 }
  0x62   :  { %2931 = vmatmul.mubr.msk.bf16.vlgmr.msra.gmra.mrb[20].mxu0 %vm324_vm1, %v22_v59  ;;  %2943 = vmatmul.mubr.msk.bf16.vlgmr.msra.gmra.mrb[20].mxu1 %vm324_vm1, %v23_v60  ;;  %v3285_v59 = vld [vmem:[%s4165_s1 + $0x320] sm:$0xff]   ;;  %v3286_v60 = vld [vmem:[%s4165_s1 + $0x308] sm:$0xff]  }
  0x63   :  { %2947 = vmatpush3.bf16.msra.mxu0 %v3236_v61  ;;  %2959 = vmatpush3.bf16.msra.mxu1 %v3237_v62  ;;  %v3287_v61 = vld [vmem:[%s4165_s1 + $0x328] sm:$0xff]   ;;  %v3288_v62 = vld [vmem:[%s4165_s1 + $0x310] sm:$0xff]  }
  0x64   :  { %2948 = vmatprep.subr.bf16.mxu0 %v3316_v0  ;;  %2960 = vmatprep.subr.bf16.mxu1 %v3316_v0 }
  0x65   :  { %2954 = vmatprep.mubr.msk.bf16.mxu0 %vm3317_vm0, %v3316_v0  ;;  %2966 = vmatprep.mubr.msk.bf16.mxu1 %vm3317_vm0, %v3316_v0 }
  0x67   :  { %2949 = vmatpush3.bf16.msra.mxu0 %v3238_v63  ;;  %2961 = vmatpush3.bf16.msra.mxu1 %v3239_v1  ;;  %v3289_v63 = vld [vmem:[%s4165_s1 + $0x330] sm:$0xff]   ;;  %v3290_v1 = vld [vmem:[%s4165_s1 + $0x318] sm:$0xff]  }
  0x68   :  { %2950 = vmatprep.subr.bf16.mxu0 %v3316_v0  ;;  %2962 = vmatprep.subr.bf16.mxu1 %v3316_v0 }
  0x6b   :  { %2951 = vmatpush3.bf16.msra.mxu0 %v3240_v2  ;;  %2963 = vmatpush3.bf16.msra.mxu1 %v3241_v3  ;;  %v3291_v2 = vld [vmem:[%s4165_s1 + $0x338] sm:$0xff]  }
  0x6c   :  { %2952 = vmatprep.subr.bf16.mxu0 %v3316_v0  ;;  %2964 = vmatprep.subr.bf16.mxu1 %v3316_v0  ;;  %v36_v3 = vld [vmem:[%s4166_s0 + $0x18] sm:$0x1] }
  0x6f   :  { %2953 = vmatpush3.bf16.msra.mxu0 %v3242_v4  ;;  %2965 = vmatpush3.bf16.msra.mxu1 %v3243_v5  ;;  %v3292_v4 = vld [vmem:[%s4165_s1 + $0x340] sm:$0xff]   ;;  %v37_v5 = vld [vmem:[%s4166_s0 + $0x19] sm:$0x1] }
  0x70   :  { %2970 = vmatprep.subr.bf16.mxu0 %v3316_v0  ;;  %2982 = vmatprep.subr.bf16.mxu1 %v3316_v0 }
  0x72   :  { %2955 = vmatmul.mubr.msk.bf16.vlgmr.msra.gmra.mrb[24].mxu0 %vm324_vm1, %v24_v6  ;;  %2967 = vmatmul.mubr.msk.bf16.vlgmr.msra.gmra.mrb[24].mxu1 %vm324_vm1, %v25_v7  ;;  %v3293_v6 = vld [vmem:[%s4165_s1 + $0x360] sm:$0xff]   ;;  %v3294_v7 = vld [vmem:[%s4165_s1 + $0x348] sm:$0xff]  }
  0x73   :  { %2971 = vmatpush3.bf16.msra.mxu0 %v3244_v8  ;;  %2983 = vmatpush3.bf16.msra.mxu1 %v3245_v9  ;;  %v3295_v8 = vld [vmem:[%s4165_s1 + $0x368] sm:$0xff]   ;;  %v3296_v9 = vld [vmem:[%s4165_s1 + $0x350] sm:$0xff]  }
  0x74   :  { %2972 = vmatprep.subr.bf16.mxu0 %v3316_v0  ;;  %2984 = vmatprep.subr.bf16.mxu1 %v3316_v0 }
  0x75   :  { %2978 = vmatprep.mubr.msk.bf16.mxu0 %vm3317_vm0, %v3316_v0  ;;  %2990 = vmatprep.mubr.msk.bf16.mxu1 %vm3317_vm0, %v3316_v0 }
  0x77   :  { %2973 = vmatpush3.bf16.msra.mxu0 %v3246_v10  ;;  %2985 = vmatpush3.bf16.msra.mxu1 %v3247_v11  ;;  %v3297_v10 = vld [vmem:[%s4165_s1 + $0x370] sm:$0xff]   ;;  %v3298_v11 = vld [vmem:[%s4165_s1 + $0x358] sm:$0xff]  }
  0x78   :  { %2974 = vmatprep.subr.bf16.mxu0 %v3316_v0  ;;  %2986 = vmatprep.subr.bf16.mxu1 %v3316_v0 }
  0x7b   :  { %2975 = vmatpush3.bf16.msra.mxu0 %v3248_v12  ;;  %2987 = vmatpush3.bf16.msra.mxu1 %v3249_v13  ;;  %v3299_v12 = vld [vmem:[%s4165_s1 + $0x378] sm:$0xff]  }
  0x7c   :  { %2976 = vmatprep.subr.bf16.mxu0 %v3316_v0  ;;  %2988 = vmatprep.subr.bf16.mxu1 %v3316_v0  ;;  %v38_v13 = vld [vmem:[%s4166_s0 + $0x1a] sm:$0x1] }
  0x7f   :  { %2977 = vmatpush3.bf16.msra.mxu0 %v3250_v14  ;;  %2989 = vmatpush3.bf16.msra.mxu1 %v3251_v15  ;;  %v3300_v14 = vld [vmem:[%s4165_s1 + $0x380] sm:$0xff]   ;;  %v39_v15 = vld [vmem:[%s4166_s0 + $0x1b] sm:$0x1] }
  0x80   :  { %2994 = vmatprep.subr.bf16.mxu0 %v3316_v0  ;;  %3006 = vmatprep.subr.bf16.mxu1 %v3316_v0 }
  0x82   :  { %2979 = vmatmul.mubr.msk.bf16.vlgmr.msra.gmra.mrb[28].mxu0 %vm324_vm1, %v26_v16  ;;  %2991 = vmatmul.mubr.msk.bf16.vlgmr.msra.gmra.mrb[28].mxu1 %vm324_vm1, %v27_v17  ;;  %v3301_v16 = vld [vmem:[%s4165_s1 + $0x3a0] sm:$0xff]   ;;  %v3302_v17 = vld [vmem:[%s4165_s1 + $0x388] sm:$0xff]  }
  0x83   :  { %2995 = vmatpush3.bf16.msra.mxu0 %v3252_v18  ;;  %3007 = vmatpush3.bf16.msra.mxu1 %v3253_v19  ;;  %v3303_v18 = vld [vmem:[%s4165_s1 + $0x3a8] sm:$0xff]  }
  0x84   :  { %2996 = vmatprep.subr.bf16.mxu0 %v3316_v0  ;;  %3008 = vmatprep.subr.bf16.mxu1 %v3316_v0 }
  0x85   :  { %3002 = vmatprep.mubr.msk.bf16.mxu0 %vm3317_vm0, %v3316_v0  ;;  %3014 = vmatprep.mubr.msk.bf16.mxu1 %vm3317_vm0, %v3316_v0 }
  0x87   :  { %2997 = vmatpush3.bf16.msra.mxu0 %v3254_v20  ;;  %3009 = vmatpush3.bf16.msra.mxu1 %v3255_v21 }
  0x88   :  { %2998 = vmatprep.subr.bf16.mxu0 %v3316_v0  ;;  %3010 = vmatprep.subr.bf16.mxu1 %v3316_v0 }
  0x8b   :  { %2999 = vmatpush3.bf16.msra.mxu0 %v3256_v22  ;;  %3011 = vmatpush3.bf16.msra.mxu1 %v3257_v23 }
  0x8c   :  { %3000 = vmatprep.subr.bf16.mxu0 %v3316_v0  ;;  %3012 = vmatprep.subr.bf16.mxu1 %v3316_v0 }
  0x8f   :  { %3001 = vmatpush3.bf16.msra.mxu0 %v3258_v24  ;;  %3013 = vmatpush3.bf16.msra.mxu1 %v3259_v25  ;;  %v3304_v24 = vld [vmem:[%s4165_s1 + $0x390] sm:$0xff]  }
  0x90   :  { %3018 = vmatprep.subr.bf16.mxu0 %v3316_v0  ;;  %3030 = vmatprep.subr.bf16.mxu1 %v3316_v0 }
  0x92   :  { %3003 = vmatmul.mubr.msk.bf16.vlgmr.msra.gmra.mrb[32].mxu0 %vm324_vm1, %v28_v26  ;;  %3015 = vmatmul.mubr.msk.bf16.vlgmr.msra.gmra.mrb[32].mxu1 %vm324_vm1, %v29_v28 }
  0x93   :  { %3019 = vmatpush3.bf16.msra.mxu0 %v3260_v27  ;;  %3031 = vmatpush3.bf16.msra.mxu1 %v3261_v29  ;;  %v3305_v27 = vld [vmem:[%s4165_s1 + $0x3b0] sm:$0xff]   ;;  %v3306_v29 = vld [vmem:[%s4165_s1 + $0x398] sm:$0xff]  }
  0x94   :  { %3020 = vmatprep.subr.bf16.mxu0 %v3316_v0  ;;  %3032 = vmatprep.subr.bf16.mxu1 %v3316_v0 }
  0x95   :  { %3026 = vmatprep.mubr.msk.bf16.mxu0 %vm3317_vm0, %v3316_v0  ;;  %3038 = vmatprep.mubr.msk.bf16.mxu1 %vm3317_vm0, %v3316_v0 }
  0x97   :  { %3021 = vmatpush3.bf16.msra.mxu0 %v3262_v30  ;;  %3033 = vmatpush3.bf16.msra.mxu1 %v3263_v31  ;;  %v3307_v30 = vld [vmem:[%s4165_s1 + $0x3b8] sm:$0xff]  }
  0x98   :  { %3022 = vmatprep.subr.bf16.mxu0 %v3316_v0  ;;  %3034 = vmatprep.subr.bf16.mxu1 %v3316_v0  ;;  %v40_v31 = vld [vmem:[%s4166_s0 + $0x1c] sm:$0x1] }
  0x9b   :  { %3023 = vmatpush3.bf16.msra.mxu0 %v3264_v32  ;;  %3035 = vmatpush3.bf16.msra.mxu1 %v3265_v33  ;;  %v3308_v32 = vld [vmem:[%s4165_s1 + $0x3c0] sm:$0xff]   ;;  %v41_v33 = vld [vmem:[%s4166_s0 + $0x1d] sm:$0x1] }
  0x9c   :  { %3024 = vmatprep.subr.bf16.mxu0 %v3316_v0  ;;  %3036 = vmatprep.subr.bf16.mxu1 %v3316_v0 }
  0x9f   :  { %3025 = vmatpush3.bf16.msra.mxu0 %v3266_v34  ;;  %3037 = vmatpush3.bf16.msra.mxu1 %v3267_v35  ;;  %v3309_v34 = vld [vmem:[%s4165_s1 + $0x3e0] sm:$0xff]   ;;  %v3310_v35 = vld [vmem:[%s4165_s1 + $0x3c8] sm:$0xff]  }
  0xa0   :  { %3042 = vmatprep.subr.bf16.mxu0 %v3316_v0  ;;  %3054 = vmatprep.subr.bf16.mxu1 %v3316_v0 }
  0xa2   :  { %3027 = vmatmul.mubr.msk.bf16.vlgmr.msra.gmra.mrb[36].mxu0 %vm324_vm1, %v30_v36  ;;  %3039 = vmatmul.mubr.msk.bf16.vlgmr.msra.gmra.mrb[36].mxu1 %vm324_vm1, %v31_v38  ;;  %v3311_v36 = vld [vmem:[%s4165_s1 + $0x3e8] sm:$0xff]  }
  0xa3   :  { %3043 = vmatpush3.bf16.msra.mxu0 %v3268_v37  ;;  %3055 = vmatpush3.bf16.msra.mxu1 %v3269_v39 }
  0xa4   :  { %3044 = vmatprep.subr.bf16.mxu0 %v3316_v0  ;;  %3056 = vmatprep.subr.bf16.mxu1 %v3316_v0 }
  0xa5   :  { %3050 = vmatprep.mubr.msk.bf16.mxu0 %vm3317_vm0, %v3316_v0  ;;  %3062 = vmatprep.mubr.msk.bf16.mxu1 %vm3317_vm0, %v3316_v0 }
  0xa7   :  { %3045 = vmatpush3.bf16.msra.mxu0 %v3270_v40  ;;  %3057 = vmatpush3.bf16.msra.mxu1 %v3271_v41 }
  0xa8   :  { %3046 = vmatprep.subr.bf16.mxu0 %v3316_v0  ;;  %3058 = vmatprep.subr.bf16.mxu1 %v3316_v0 }
  0xab   :  { %3047 = vmatpush3.bf16.msra.mxu0 %v3272_v42  ;;  %3059 = vmatpush3.bf16.msra.mxu1 %v3273_v43  ;;  %v3312_v42 = vld [vmem:[%s4165_s1 + $0x3d0] sm:$0xff]  }
  0xac   :  { %3048 = vmatprep.subr.bf16.mxu0 %v3316_v0  ;;  %3060 = vmatprep.subr.bf16.mxu1 %v3316_v0 }
  0xaf   :  { %3049 = vmatpush3.bf16.msra.mxu0 %v3274_v44  ;;  %3061 = vmatpush3.bf16.msra.mxu1 %v3275_v45  ;;  %v3313_v45 = vld [vmem:[%s4165_s1 + $0x3f0] sm:$0xff]  }
  0xb0   :  { %3066 = vmatprep.subr.bf16.mxu0 %v3316_v0  ;;  %3078 = vmatprep.subr.bf16.mxu1 %v3316_v0 }
  0xb2   :  { %3051 = vmatmul.mubr.msk.bf16.vlgmr.msra.gmra.mrb[40].mxu0 %vm324_vm1, %v32_v46  ;;  %3063 = vmatmul.mubr.msk.bf16.vlgmr.msra.gmra.mrb[40].mxu1 %vm324_vm1, %v33_v48  ;;  %v3315_v48 = vld [vmem:[%s4165_s1 + $0x3f8] sm:$0xff]  }
  0xb3   :  { %3067 = vmatpush3.bf16.msra.mxu0 %v3276_v47  ;;  %3079 = vmatpush3.bf16.msra.mxu1 %v3277_v49  ;;  %v3314_v47 = vld [vmem:[%s4165_s1 + $0x3d8] sm:$0xff]  }
  0xb4   :  { %3068 = vmatprep.subr.bf16.mxu0 %v3316_v0  ;;  %3080 = vmatprep.subr.bf16.mxu1 %v3316_v0  ;;  %v42_v49 = vld [vmem:[%s4166_s0 + $0x1e] sm:$0x1] }
  0xb5   :  { %3074 = vmatprep.mubr.msk.bf16.mxu0 %vm3317_vm0, %v3316_v0  ;;  %3086 = vmatprep.mubr.msk.bf16.mxu1 %vm3317_vm0, %v3316_v0 }
  0xb7   :  { %3069 = vmatpush3.bf16.msra.mxu0 %v3278_v50  ;;  %3081 = vmatpush3.bf16.msra.mxu1 %v3279_v51  ;;  %v43_v50 = vld [vmem:[%s4166_s0 + $0x1f] sm:$0x1] }
  0xb8   :  { %3070 = vmatprep.subr.bf16.mxu0 %v3316_v0  ;;  %3082 = vmatprep.subr.bf16.mxu1 %v3316_v0 }
  0xbb   :  { %3071 = vmatpush3.bf16.msra.mxu0 %v3280_v52  ;;  %3083 = vmatpush3.bf16.msra.mxu1 %v3281_v53 }
  0xbc   :  { %3072 = vmatprep.subr.bf16.mxu0 %v3316_v0  ;;  %3084 = vmatprep.subr.bf16.mxu1 %v3316_v0 }
  0xbf   :  { %3073 = vmatpush3.bf16.msra.mxu0 %v3282_v54  ;;  %3085 = vmatpush3.bf16.msra.mxu1 %v3283_v55 }
  0xc0   :  { %3090 = vmatprep.subr.bf16.mxu0 %v3316_v0  ;;  %3102 = vmatprep.subr.bf16.mxu1 %v3316_v0 }
  0xc2   :  { %3075 = vmatmul.mubr.msk.bf16.vlgmr.msra.gmra.mrb[44].mxu0 %vm324_vm1, %v34_v56  ;;  %3087 = vmatmul.mubr.msk.bf16.vlgmr.msra.gmra.mrb[44].mxu1 %vm324_vm1, %v35_v58 }
  0xc3   :  { %3091 = vmatpush3.bf16.msra.mxu0 %v3284_v57  ;;  %3103 = vmatpush3.bf16.msra.mxu1 %v3285_v59 }
  0xc4   :  { %3092 = vmatprep.subr.bf16.mxu0 %v3316_v0  ;;  %3104 = vmatprep.subr.bf16.mxu1 %v3316_v0 }
  0xc5   :  { %3098 = vmatprep.mubr.msk.bf16.mxu0 %vm3317_vm0, %v3316_v0  ;;  %3110 = vmatprep.mubr.msk.bf16.mxu1 %vm3317_vm0, %v3316_v0 }
  0xc7   :  { %3093 = vmatpush3.bf16.msra.mxu0 %v3286_v60  ;;  %3105 = vmatpush3.bf16.msra.mxu1 %v3287_v61 }
  0xc8   :  { %3094 = vmatprep.subr.bf16.mxu0 %v3316_v0  ;;  %3106 = vmatprep.subr.bf16.mxu1 %v3316_v0 }
  0xcb   :  { %3095 = vmatpush3.bf16.msra.mxu0 %v3288_v62  ;;  %3107 = vmatpush3.bf16.msra.mxu1 %v3289_v63 }
  0xcc   :  { %3096 = vmatprep.subr.bf16.mxu0 %v3316_v0  ;;  %3108 = vmatprep.subr.bf16.mxu1 %v3316_v0 }
  0xcf   :  { %3097 = vmatpush3.bf16.msra.mxu0 %v3290_v1  ;;  %3109 = vmatpush3.bf16.msra.mxu1 %v3291_v2 }
  0xd0   :  { %3114 = vmatprep.subr.bf16.mxu0 %v3316_v0  ;;  %3126 = vmatprep.subr.bf16.mxu1 %v3316_v0 }
  0xd2   :  { %3099 = vmatmul.mubr.msk.bf16.vlgmr.msra.gmra.mrb[48].mxu0 %vm324_vm1, %v36_v3  ;;  %3111 = vmatmul.mubr.msk.bf16.vlgmr.msra.gmra.mrb[48].mxu1 %vm324_vm1, %v37_v5 }
  0xd3   :  { %3115 = vmatpush3.bf16.msra.mxu0 %v3292_v4  ;;  %3127 = vmatpush3.bf16.msra.mxu1 %v3293_v6 }
  0xd4   :  { %3116 = vmatprep.subr.bf16.mxu0 %v3316_v0  ;;  %3128 = vmatprep.subr.bf16.mxu1 %v3316_v0 }
  0xd5   :  { %3122 = vmatprep.mubr.msk.bf16.mxu0 %vm3317_vm0, %v3316_v0  ;;  %3134 = vmatprep.mubr.msk.bf16.mxu1 %vm3317_vm0, %v3316_v0 }
  0xd7   :  { %3117 = vmatpush3.bf16.msra.mxu0 %v3294_v7  ;;  %3129 = vmatpush3.bf16.msra.mxu1 %v3295_v8 }
  0xd8   :  { %3118 = vmatprep.subr.bf16.mxu0 %v3316_v0  ;;  %3130 = vmatprep.subr.bf16.mxu1 %v3316_v0 }
  0xdb   :  { %3119 = vmatpush3.bf16.msra.mxu0 %v3296_v9  ;;  %3131 = vmatpush3.bf16.msra.mxu1 %v3297_v10 }
  0xdc   :  { %3120 = vmatprep.subr.bf16.mxu0 %v3316_v0  ;;  %3132 = vmatprep.subr.bf16.mxu1 %v3316_v0 }
  0xdf   :  { %3121 = vmatpush3.bf16.msra.mxu0 %v3298_v11  ;;  %3133 = vmatpush3.bf16.msra.mxu1 %v3299_v12 }
  0xe0   :  { %3138 = vmatprep.subr.bf16.mxu0 %v3316_v0  ;;  %3150 = vmatprep.subr.bf16.mxu1 %v3316_v0 }
  0xe2   :  { %3123 = vmatmul.mubr.msk.bf16.vlgmr.msra.gmra.mrb[52].mxu0 %vm324_vm1, %v38_v13  ;;  %3135 = vmatmul.mubr.msk.bf16.vlgmr.msra.gmra.mrb[52].mxu1 %vm324_vm1, %v39_v15 }
  0xe3   :  { %3139 = vmatpush3.bf16.msra.mxu0 %v3300_v14  ;;  %3151 = vmatpush3.bf16.msra.mxu1 %v3301_v16 }
  0xe4   :  { %3140 = vmatprep.subr.bf16.mxu0 %v3316_v0  ;;  %3152 = vmatprep.subr.bf16.mxu1 %v3316_v0 }
  0xe5   :  { %v362_v19 = vpop.f32.mrb[0].mxu0  ;;  %3146 = vmatprep.mubr.msk.bf16.mxu0 %vm3317_vm0, %v3316_v0  ;;  %v429_v20 = vpop.f32.mrb[0].mxu1  ;;  %3158 = vmatprep.mubr.msk.bf16.mxu1 %vm3317_vm0, %v3316_v0 }
  0xe6   :  { %2446 = vst.msk [vmem:[%s4167_s2] sm:$0x3] %vm2445_vm2, %v362_v19  ;;  %v2812_v21 = vpop.f32.mrb[1].mxu0  ;;  %2447 = vst.msk [vmem:[%s4167_s2 + $0x2] sm:$0x3] %vm2445_vm2, %v429_v20  ;;  %v2824_v22 = vpop.f32.mrb[1].mxu1 }
  0xe7   :  { %v365_v23 = vpop.f32.mrb[2].mxu0  ;;  %3141 = vmatpush3.bf16.msra.mxu0 %v3302_v17  ;;  %v432_v25 = vpop.f32.mrb[2].mxu1  ;;  %3153 = vmatpush3.bf16.msra.mxu1 %v3303_v18 }
  0xe8   :  { %v2813_v26 = vpop.f32.mrb[3].mxu0  ;;  %3142 = vmatprep.subr.bf16.mxu0 %v3316_v0  ;;  %v2825_v28 = vpop.f32.mrb[3].mxu1  ;;  %3154 = vmatprep.subr.bf16.mxu1 %v3316_v0 }
  0xeb   :  { %3143 = vmatpush3.bf16.msra.mxu0 %v3304_v24  ;;  %3155 = vmatpush3.bf16.msra.mxu1 %v3305_v27 }
  0xec   :  { %3144 = vmatprep.subr.bf16.mxu0 %v3316_v0  ;;  %3156 = vmatprep.subr.bf16.mxu1 %v3316_v0 }
  0xef   :  { %3145 = vmatpush3.bf16.msra.mxu0 %v3306_v29  ;;  %3157 = vmatpush3.bf16.msra.mxu1 %v3307_v30 }
  0xf0   :  { %3162 = vmatprep.subr.bf16.mxu0 %v3316_v0  ;;  %3174 = vmatprep.subr.bf16.mxu1 %v3316_v0 }
  0xf2   :  { %3147 = vmatmul.mubr.msk.bf16.vlgmr.msra.gmra.mrb[56].mxu0 %vm324_vm1, %v40_v31  ;;  %3159 = vmatmul.mubr.msk.bf16.vlgmr.msra.gmra.mrb[56].mxu1 %vm324_vm1, %v41_v33 }
  0xf3   :  { %3163 = vmatpush3.bf16.msra.mxu0 %v3308_v32  ;;  %3175 = vmatpush3.bf16.msra.mxu1 %v3309_v34 }
  0xf4   :  { %3164 = vmatprep.subr.bf16.mxu0 %v3316_v0  ;;  %3176 = vmatprep.subr.bf16.mxu1 %v3316_v0 }
  0xf5   :  { %v496_v37 = vpop.f32.mrb[4].mxu0  ;;  %3170 = vmatprep.mubr.msk.bf16.mxu0 %vm3317_vm0, %v3316_v0  ;;  %v563_v38 = vpop.f32.mrb[4].mxu1  ;;  %3182 = vmatprep.mubr.msk.bf16.mxu1 %vm3317_vm0, %v3316_v0 }
  0xf6   :  { %2448 = vst.msk [vmem:[%s4167_s2 + $0x4] sm:$0x3] %vm2445_vm2, %v496_v37  ;;  %v2836_v39 = vpop.f32.mrb[5].mxu0  ;;  %2449 = vst.msk [vmem:[%s4167_s2 + $0x6] sm:$0x3] %vm2445_vm2, %v563_v38  ;;  %v2848_v40 = vpop.f32.mrb[5].mxu1 }
  0xf7   :  { %v499_v41 = vpop.f32.mrb[6].mxu0  ;;  %3165 = vmatpush3.bf16.msra.mxu0 %v3310_v35  ;;  %v566_v43 = vpop.f32.mrb[6].mxu1  ;;  %3177 = vmatpush3.bf16.msra.mxu1 %v3311_v36 }
  0xf8   :  { %v2837_v44 = vpop.f32.mrb[7].mxu0  ;;  %3166 = vmatprep.subr.bf16.mxu0 %v3316_v0  ;;  %v2849_v46 = vpop.f32.mrb[7].mxu1  ;;  %3178 = vmatprep.subr.bf16.mxu1 %v3316_v0 }
  0xfb   :  { %3167 = vmatpush3.bf16.msra.mxu0 %v3312_v42  ;;  %3179 = vmatpush3.bf16.msra.mxu1 %v3313_v45 }
  0xfc   :  { %3168 = vmatprep.subr.bf16.mxu0 %v3316_v0  ;;  %3180 = vmatprep.subr.bf16.mxu1 %v3316_v0 }
  0xff   :  { %3169 = vmatpush3.bf16.msra.mxu0 %v3314_v47  ;;  %3181 = vmatpush3.bf16.msra.mxu1 %v3315_v48 }
 0x102   :  { %3171 = vmatmul.mubr.msk.bf16.vlgmr.msra.gmra.mrb[60].mxu0 %vm324_vm1, %v42_v49  ;;  %3183 = vmatmul.mubr.msk.bf16.vlgmr.msra.gmra.mrb[60].mxu1 %vm324_vm1, %v43_v50 }
 0x105   :  { %v630_v51 = vpop.f32.mrb[8].mxu0  ;;  %v697_v0 = vpop.f32.mrb[8].mxu1 }
 0x106   :  { %2450 = vst.msk [vmem:[%s4167_s2 + $0x8] sm:$0x3] %vm2445_vm2, %v630_v51  ;;  %v2860_v52 = vpop.f32.mrb[9].mxu0  ;;  %2451 = vst.msk [vmem:[%s4167_s2 + $0xa] sm:$0x3] %vm2445_vm2, %v697_v0  ;;  %v2872_v53 = vpop.f32.mrb[9].mxu1 }
 0x107   :  { %v633_v54 = vpop.f32.mrb[10].mxu0  ;;  %v700_v55 = vpop.f32.mrb[10].mxu1 }
 0x108   :  { %v2861_v56 = vpop.f32.mrb[11].mxu0  ;;  %v2873_v57 = vpop.f32.mrb[11].mxu1 }
 0x115   :  { %v764_v58 = vpop.f32.mrb[12].mxu0  ;;  %v831_v59 = vpop.f32.mrb[12].mxu1 }
 0x116   :  { %2452 = vst.msk [vmem:[%s4167_s2 + $0xc] sm:$0x3] %vm2445_vm2, %v764_v58  ;;  %v2884_v60 = vpop.f32.mrb[13].mxu0  ;;  %2453 = vst.msk [vmem:[%s4167_s2 + $0xe] sm:$0x3] %vm2445_vm2, %v831_v59  ;;  %v2896_v61 = vpop.f32.mrb[13].mxu1 }
 0x117   :  { %v767_v62 = vpop.f32.mrb[14].mxu0  ;;  %v834_v63 = vpop.f32.mrb[14].mxu1 }
 0x118   :  { %v2885_v1 = vpop.f32.mrb[15].mxu0  ;;  %v2897_v2 = vpop.f32.mrb[15].mxu1 }
 0x125   :  { %v898_v3 = vpop.f32.mrb[16].mxu0  ;;  %v965_v4 = vpop.f32.mrb[16].mxu1 }
 0x126   :  { %2454 = vst.msk [vmem:[%s4167_s2 + $0x10] sm:$0x3] %vm2445_vm2, %v898_v3  ;;  %v2908_v5 = vpop.f32.mrb[17].mxu0  ;;  %2455 = vst.msk [vmem:[%s4167_s2 + $0x12] sm:$0x3] %vm2445_vm2, %v965_v4  ;;  %v2920_v6 = vpop.f32.mrb[17].mxu1 }
 0x127   :  { %v901_v7 = vpop.f32.mrb[18].mxu0  ;;  %v968_v8 = vpop.f32.mrb[18].mxu1 }
 0x128   :  { %v2909_v9 = vpop.f32.mrb[19].mxu0  ;;  %v2921_v10 = vpop.f32.mrb[19].mxu1 }
 0x135   :  { %v1032_v11 = vpop.f32.mrb[20].mxu0  ;;  %v1099_v12 = vpop.f32.mrb[20].mxu1 }
 0x136   :  { %2456 = vst.msk [vmem:[%s4167_s2 + $0x14] sm:$0x3] %vm2445_vm2, %v1032_v11  ;;  %v2932_v13 = vpop.f32.mrb[21].mxu0  ;;  %2457 = vst.msk [vmem:[%s4167_s2 + $0x16] sm:$0x3] %vm2445_vm2, %v1099_v12  ;;  %v2944_v14 = vpop.f32.mrb[21].mxu1 }
 0x137   :  { %v1035_v15 = vpop.f32.mrb[22].mxu0  ;;  %v1102_v16 = vpop.f32.mrb[22].mxu1 }
 0x138   :  { %v2933_v17 = vpop.f32.mrb[23].mxu0  ;;  %v2945_v18 = vpop.f32.mrb[23].mxu1 }
 0x145   :  { %v1166_v19 = vpop.f32.mrb[24].mxu0  ;;  %v1233_v20 = vpop.f32.mrb[24].mxu1 }
 0x146   :  { %2458 = vst.msk [vmem:[%s4167_s2 + $0x18] sm:$0x3] %vm2445_vm2, %v1166_v19  ;;  %v2956_v21 = vpop.f32.mrb[25].mxu0  ;;  %2459 = vst.msk [vmem:[%s4167_s2 + $0x1a] sm:$0x3] %vm2445_vm2, %v1233_v20  ;;  %v2968_v22 = vpop.f32.mrb[25].mxu1 }
 0x147   :  { %v1169_v23 = vpop.f32.mrb[26].mxu0  ;;  %v1236_v24 = vpop.f32.mrb[26].mxu1 }
 0x148   :  { %v2957_v25 = vpop.f32.mrb[27].mxu0  ;;  %v2969_v26 = vpop.f32.mrb[27].mxu1 }
 0x155   :  { %v1300_v27 = vpop.f32.mrb[28].mxu0  ;;  %v1367_v28 = vpop.f32.mrb[28].mxu1 }
 0x156   :  { %2460 = vst.msk [vmem:[%s4167_s2 + $0x1c] sm:$0x3] %vm2445_vm2, %v1300_v27  ;;  %v2980_v29 = vpop.f32.mrb[29].mxu0  ;;  %2461 = vst.msk [vmem:[%s4167_s2 + $0x1e] sm:$0x3] %vm2445_vm2, %v1367_v28  ;;  %v2992_v30 = vpop.f32.mrb[29].mxu1 }
 0x157   :  { %v1303_v31 = vpop.f32.mrb[30].mxu0  ;;  %v1370_v32 = vpop.f32.mrb[30].mxu1 }
 0x158   :  { %v2981_v33 = vpop.f32.mrb[31].mxu0  ;;  %v2993_v34 = vpop.f32.mrb[31].mxu1 }
 0x165   :  { %v1434_v35 = vpop.f32.mrb[32].mxu0  ;;  %v1501_v36 = vpop.f32.mrb[32].mxu1 }
 0x166   :  { %2462 = vst.msk [vmem:[%s4167_s2 + $0x20] sm:$0x3] %vm2445_vm2, %v1434_v35  ;;  %v3004_v37 = vpop.f32.mrb[33].mxu0  ;;  %2463 = vst.msk [vmem:[%s4167_s2 + $0x22] sm:$0x3] %vm2445_vm2, %v1501_v36  ;;  %v3016_v38 = vpop.f32.mrb[33].mxu1 }
 0x167   :  { %v1437_v39 = vpop.f32.mrb[34].mxu0  ;;  %v1504_v40 = vpop.f32.mrb[34].mxu1 }
 0x168   :  { %v3005_v41 = vpop.f32.mrb[35].mxu0  ;;  %v3017_v42 = vpop.f32.mrb[35].mxu1 }
 0x175   :  { %v1568_v43 = vpop.f32.mrb[36].mxu0  ;;  %v1635_v44 = vpop.f32.mrb[36].mxu1 }
 0x176   :  { %2464 = vst.msk [vmem:[%s4167_s2 + $0x24] sm:$0x3] %vm2445_vm2, %v1568_v43  ;;  %v3028_v45 = vpop.f32.mrb[37].mxu0  ;;  %2465 = vst.msk [vmem:[%s4167_s2 + $0x26] sm:$0x3] %vm2445_vm2, %v1635_v44  ;;  %v3040_v46 = vpop.f32.mrb[37].mxu1 }
 0x177   :  { %v1571_v47 = vpop.f32.mrb[38].mxu0  ;;  %v1638_v48 = vpop.f32.mrb[38].mxu1 }
 0x178   :  { %v3029_v49 = vpop.f32.mrb[39].mxu0  ;;  %v3041_v50 = vpop.f32.mrb[39].mxu1 }
 0x185   :  { %v1702_v51 = vpop.f32.mrb[40].mxu0  ;;  %v1769_v0 = vpop.f32.mrb[40].mxu1 }
 0x186   :  { %2466 = vst.msk [vmem:[%s4167_s2 + $0x28] sm:$0x3] %vm2445_vm2, %v1702_v51  ;;  %v3052_v52 = vpop.f32.mrb[41].mxu0  ;;  %2467 = vst.msk [vmem:[%s4167_s2 + $0x2a] sm:$0x3] %vm2445_vm2, %v1769_v0  ;;  %v3064_v53 = vpop.f32.mrb[41].mxu1 }
 0x187   :  { %v1705_v54 = vpop.f32.mrb[42].mxu0  ;;  %v1772_v55 = vpop.f32.mrb[42].mxu1 }
 0x188   :  { %v3053_v56 = vpop.f32.mrb[43].mxu0  ;;  %v3065_v57 = vpop.f32.mrb[43].mxu1 }
 0x195   :  { %v1836_v58 = vpop.f32.mrb[44].mxu0  ;;  %v1903_v59 = vpop.f32.mrb[44].mxu1 }
 0x196   :  { %2468 = vst.msk [vmem:[%s4167_s2 + $0x2c] sm:$0x3] %vm2445_vm2, %v1836_v58  ;;  %v3076_v60 = vpop.f32.mrb[45].mxu0  ;;  %2469 = vst.msk [vmem:[%s4167_s2 + $0x2e] sm:$0x3] %vm2445_vm2, %v1903_v59  ;;  %v3088_v61 = vpop.f32.mrb[45].mxu1 }
 0x197   :  { %v1839_v62 = vpop.f32.mrb[46].mxu0  ;;  %v1906_v63 = vpop.f32.mrb[46].mxu1 }
 0x198   :  { %v3077_v1 = vpop.f32.mrb[47].mxu0  ;;  %v3089_v2 = vpop.f32.mrb[47].mxu1 }
 0x1a5   :  { %v1970_v3 = vpop.f32.mrb[48].mxu0  ;;  %v2037_v4 = vpop.f32.mrb[48].mxu1 }
 0x1a6   :  { %2470 = vst.msk [vmem:[%s4167_s2 + $0x30] sm:$0x3] %vm2445_vm2, %v1970_v3  ;;  %v3100_v5 = vpop.f32.mrb[49].mxu0  ;;  %2471 = vst.msk [vmem:[%s4167_s2 + $0x32] sm:$0x3] %vm2445_vm2, %v2037_v4  ;;  %v3112_v6 = vpop.f32.mrb[49].mxu1 }
 0x1a7   :  { %v1973_v7 = vpop.f32.mrb[50].mxu0  ;;  %v2040_v8 = vpop.f32.mrb[50].mxu1 }
 0x1a8   :  { %v3101_v9 = vpop.f32.mrb[51].mxu0  ;;  %v3113_v10 = vpop.f32.mrb[51].mxu1 }
 0x1b5   :  { %v2104_v11 = vpop.f32.mrb[52].mxu0  ;;  %v2171_v12 = vpop.f32.mrb[52].mxu1 }
 0x1b6   :  { %2472 = vst.msk [vmem:[%s4167_s2 + $0x34] sm:$0x3] %vm2445_vm2, %v2104_v11  ;;  %v3124_v13 = vpop.f32.mrb[53].mxu0  ;;  %2473 = vst.msk [vmem:[%s4167_s2 + $0x36] sm:$0x3] %vm2445_vm2, %v2171_v12  ;;  %v3136_v14 = vpop.f32.mrb[53].mxu1 }
 0x1b7   :  { %v2107_v15 = vpop.f32.mrb[54].mxu0  ;;  %v2174_v16 = vpop.f32.mrb[54].mxu1 }
 0x1b8   :  { %v3125_v17 = vpop.f32.mrb[55].mxu0  ;;  %v3137_v18 = vpop.f32.mrb[55].mxu1 }
 0x1c5   :  { %v2238_v19 = vpop.f32.mrb[56].mxu0  ;;  %v2305_v20 = vpop.f32.mrb[56].mxu1 }
 0x1c6   :  { %2474 = vst.msk [vmem:[%s4167_s2 + $0x38] sm:$0x3] %vm2445_vm2, %v2238_v19  ;;  %v3148_v21 = vpop.f32.mrb[57].mxu0  ;;  %2475 = vst.msk [vmem:[%s4167_s2 + $0x3a] sm:$0x3] %vm2445_vm2, %v2305_v20  ;;  %v3160_v22 = vpop.f32.mrb[57].mxu1 }
 0x1c7   :  { %v2241_v23 = vpop.f32.mrb[58].mxu0  ;;  %v2308_v24 = vpop.f32.mrb[58].mxu1 }
 0x1c8   :  { %v3149_v25 = vpop.f32.mrb[59].mxu0  ;;  %v3161_v26 = vpop.f32.mrb[59].mxu1 }
 0x1d5   :  { %v2372_v27 = vpop.f32.mrb[60].mxu0  ;;  %v2439_v28 = vpop.f32.mrb[60].mxu1 }
 0x1d6   :  { %2476 = vst.msk [vmem:[%s4167_s2 + $0x3c] sm:$0x3] %vm2445_vm2, %v2372_v27  ;;  %v3172_v29 = vpop.f32.mrb[61].mxu0  ;;  %2477 = vst.msk [vmem:[%s4167_s2 + $0x3e] sm:$0x3] %vm2445_vm2, %v2439_v28  ;;  %v3184_v30 = vpop.f32.mrb[61].mxu1 }
 0x1d7   :  { %v2375_v31 = vpop.f32.mrb[62].mxu0  ;;  %v2442_v32 = vpop.f32.mrb[62].mxu1 }
 0x1d8   :  { %v3173_v33 = vpop.f32.mrb[63].mxu0  ;;  %v3185_v34 = vpop.f32.mrb[63].mxu1 }

// kernel: reverse.6
= control target key start
LH: loop header
LB: loop body
LE: loop exit
PB: predicated region body
PF: predicated region fallthrough
CT: control target
= control target key end

     0   :  { %s344_s0 = inlined_call_operand.vmem [shape: f32[32,2,16,7], index: 0, kind: input, shape index: {}]   ;;  %s345_s1 = inlined_call_operand.vmem [shape: f32[32,2,16,7], index: 1, kind: output, shape index: {}]  }
   0x1   :  { %v112_v0 = vld [vmem:[%s344_s0 + $0x60] sm:$0xff]  ;;  %v113_v1 = vld [vmem:[%s344_s0 + $0xd0] sm:$0xff]  ;;  %v138_v14 = vld [vmem:[%s344_s0 + $0x68] sm:$0xff] }
   0x2   :  { %v115_v2 = vld [vmem:[%s344_s0 + $0x50] sm:$0xff]  ;;  %4 = vst [vmem:[%s345_s1] sm:$0xff] %v112_v0  ;;  %114 = vst [vmem:[%s345_s1 + $0x70] sm:$0xff] %v113_v1  ;;  %v117_v3 = vld [vmem:[%s344_s0 + $0xc0] sm:$0xff] }
   0x3   :  { %116 = vst [vmem:[%s345_s1 + $0x10] sm:$0xff] %v115_v2  ;;  %v119_v4 = vld [vmem:[%s344_s0 + $0x40] sm:$0xff]  ;;  %v121_v5 = vld [vmem:[%s344_s0 + $0xb0] sm:$0xff]  ;;  %118 = vst [vmem:[%s345_s1 + $0x80] sm:$0xff] %v117_v3 }
   0x4   :  { %120 = vst [vmem:[%s345_s1 + $0x20] sm:$0xff] %v119_v4  ;;  %122 = vst [vmem:[%s345_s1 + $0x90] sm:$0xff] %v121_v5  ;;  %v123_v6 = vld [vmem:[%s344_s0 + $0x30] sm:$0xff]  ;;  %v125_v7 = vld [vmem:[%s344_s0 + $0xa0] sm:$0xff] }
   0x5   :  { %v127_v8 = vld [vmem:[%s344_s0 + $0x20] sm:$0xff]  ;;  %124 = vst [vmem:[%s345_s1 + $0x30] sm:$0xff] %v123_v6  ;;  %126 = vst [vmem:[%s345_s1 + $0xa0] sm:$0xff] %v125_v7  ;;  %v129_v9 = vld [vmem:[%s344_s0 + $0x90] sm:$0xff] }
   0x6   :  { %128 = vst [vmem:[%s345_s1 + $0x40] sm:$0xff] %v127_v8  ;;  %v131_v10 = vld [vmem:[%s344_s0 + $0x10] sm:$0xff]  ;;  %v133_v11 = vld [vmem:[%s344_s0 + $0x80] sm:$0xff]  ;;  %130 = vst [vmem:[%s345_s1 + $0xb0] sm:$0xff] %v129_v9 }
   0x7   :  { %132 = vst [vmem:[%s345_s1 + $0x50] sm:$0xff] %v131_v10  ;;  %134 = vst [vmem:[%s345_s1 + $0xc0] sm:$0xff] %v133_v11  ;;  %v49_v12 = vld [vmem:[%s344_s0] sm:$0xff]  ;;  %v136_v13 = vld [vmem:[%s344_s0 + $0x70] sm:$0xff] }
   0x8   :  { %135 = vst [vmem:[%s345_s1 + $0x60] sm:$0xff] %v49_v12  ;;  %137 = vst [vmem:[%s345_s1 + $0xd0] sm:$0xff] %v136_v13  ;;  %v140_v15 = vld [vmem:[%s344_s0 + $0xd8] sm:$0xff]  ;;  %v144_v17 = vld [vmem:[%s344_s0 + $0xc8] sm:$0xff] }
   0x9   :  { %139 = vst [vmem:[%s345_s1 + $0x8] sm:$0xff] %v138_v14  ;;  %v142_v16 = vld [vmem:[%s344_s0 + $0x58] sm:$0xff]  ;;  %141 = vst [vmem:[%s345_s1 + $0x78] sm:$0xff] %v140_v15  ;;  %v146_v18 = vld [vmem:[%s344_s0 + $0x48] sm:$0xff] }
   0xa   :  { %143 = vst [vmem:[%s345_s1 + $0x18] sm:$0xff] %v142_v16  ;;  %145 = vst [vmem:[%s345_s1 + $0x88] sm:$0xff] %v144_v17  ;;  %v148_v19 = vld [vmem:[%s344_s0 + $0xb8] sm:$0xff]  ;;  %v152_v21 = vld [vmem:[%s344_s0 + $0xa8] sm:$0xff] }
   0xb   :  { %v150_v20 = vld [vmem:[%s344_s0 + $0x38] sm:$0xff]  ;;  %147 = vst [vmem:[%s345_s1 + $0x28] sm:$0xff] %v146_v18  ;;  %149 = vst [vmem:[%s345_s1 + $0x98] sm:$0xff] %v148_v19  ;;  %v154_v22 = vld [vmem:[%s344_s0 + $0x28] sm:$0xff] }
   0xc   :  { %151 = vst [vmem:[%s345_s1 + $0x38] sm:$0xff] %v150_v20  ;;  %v156_v23 = vld [vmem:[%s344_s0 + $0x98] sm:$0xff]  ;;  %153 = vst [vmem:[%s345_s1 + $0xa8] sm:$0xff] %v152_v21  ;;  %v160_v25 = vld [vmem:[%s344_s0 + $0x88] sm:$0xff] }
   0xd   :  { %155 = vst [vmem:[%s345_s1 + $0x48] sm:$0xff] %v154_v22  ;;  %157 = vst [vmem:[%s345_s1 + $0xb8] sm:$0xff] %v156_v23  ;;  %v158_v24 = vld [vmem:[%s344_s0 + $0x18] sm:$0xff]  ;;  %v162_v26 = vld [vmem:[%s344_s0 + $0x8] sm:$0xff] }
   0xe   :  { %159 = vst [vmem:[%s345_s1 + $0x58] sm:$0xff] %v158_v24  ;;  %161 = vst [vmem:[%s345_s1 + $0xc8] sm:$0xff] %v160_v25  ;;  %v164_v27 = vld [vmem:[%s344_s0 + $0x78] sm:$0xff] }
   0xf   :  { %163 = vst [vmem:[%s345_s1 + $0x68] sm:$0xff] %v162_v26  ;;  %165 = vst [vmem:[%s345_s1 + $0xd8] sm:$0xff] %v164_v27 }

// kernel: fno_forward_pallas.10
= control target key start
LH: loop header
LB: loop body
LE: loop exit
PB: predicated region body
PF: predicated region fallthrough
CT: control target
= control target key end

     0   :  { %v420_v3 = vmov 0   ;;  %vm72_vm0 = vcmask 261120   ;;  %s719_s1 = inlined_call_operand.vmem [shape: f32[32,512], index: 1, kind: input, shape index: {}]   ;;  %s720_s2 = inlined_call_operand.vmem [shape: f32[32,32], index: 2, kind: input, shape index: {}]   ;;  %s721_s3 = inlined_call_operand.vmem [shape: f32[32,1], index: 3, kind: input, shape index: {}]   ;;  %s722_s0 = inlined_call_operand.vmem [shape: f32[32,512], index: 0, kind: input, shape index: {}]   ;;  %s723_s4 = inlined_call_operand.vmem [shape: f32[32,512], index: 4, kind: output, shape index: {}]  }
   0x1   :  { %v19_v0 = vld [vmem:[%s719_s1 + $0x8] sm:$0xff]  ;;  %v21_v2 = vld [vmem:[%s719_s1 + $0x18] sm:$0xff]  ;;  %111 = vmatprep.mubr.bf16.mxu0 %v420_v3  ;;  %164 = vmatprep.mubr.bf16.mxu1 %v420_v3  ;;  %v18_v6 = vld [vmem:[%s719_s1] sm:$0xff] }
   0x2   :  { %v23_v1 = vld [vmem:[%s719_s1 + $0x28] sm:$0xff]  ;;  %v25_v5 = vld [vmem:[%s719_s1 + $0x38] sm:$0xff]  ;;  %v22_v7 = vld [vmem:[%s719_s1 + $0x20] sm:$0xff]  ;;  %386 = vset.pattern.permute.xlu0 %v420_v3  ;;  %387 = vset.pattern.permute.xlu1 %v420_v3 }
   0x3   :  { %v35_v4 = vpack.c.bf16 %v23_v1, %v19_v0  ;;  %v37_v8 = vpack.c.bf16 %v25_v5, %v21_v2  ;;  %v34_v9 = vpack.c.bf16 %v22_v7, %v18_v6  ;;  %v20_v10 = vld [vmem:[%s719_s1 + $0x10] sm:$0xff]  ;;  %v27_v12 = vld [vmem:[%s719_s1 + $0x48] sm:$0xff]  ;;  %v29_v15 = vld [vmem:[%s719_s1 + $0x58] sm:$0xff] }
   0x4   :  { %v24_v11 = vld [vmem:[%s719_s1 + $0x30] sm:$0xff]  ;;  %v31_v14 = vld [vmem:[%s719_s1 + $0x68] sm:$0xff]  ;;  %v33_v16 = vld [vmem:[%s719_s1 + $0x78] sm:$0xff] }
   0x5   :  { %79 = vmatprep.subr.bf16.mxu0 %v35_v4  ;;  %v36_v13 = vpack.c.bf16 %v24_v11, %v20_v10  ;;  %132 = vmatprep.subr.bf16.mxu1 %v37_v8  ;;  %v39_v17 = vpack.c.bf16 %v31_v14, %v27_v12  ;;  %v41_v18 = vpack.c.bf16 %v33_v16, %v29_v15  ;;  %v26_v19 = vld [vmem:[%s719_s1 + $0x40] sm:$0xff]  ;;  %v28_v21 = vld [vmem:[%s719_s1 + $0x50] sm:$0xff]  ;;  %v43_v25 = vld [vmem:[%s720_s2 + $0x8] sm:$0xff] }
   0x6   :  { %80 = vmatpush1.bf16.msra.mxu0 %v34_v9  ;;  %v30_v20 = vld [vmem:[%s719_s1 + $0x60] sm:$0xff]  ;;  %v32_v23 = vld [vmem:[%s719_s1 + $0x70] sm:$0xff]  ;;  %v49_v30 = vld [vmem:[%s721_s3 + $0x8] sm:$0xff] }
   0x7   :  { %133 = vmatpush1.bf16.msra.mxu1 %v36_v13  ;;  %v38_v22 = vpack.c.bf16 %v30_v20, %v26_v19  ;;  %v42_v24 = vld [vmem:[%s720_s2] sm:$0xff]  ;;  %81 = vmatprep.subr.bf16.mxu0 %v39_v17  ;;  %v40_v26 = vpack.c.bf16 %v32_v23, %v28_v21  ;;  %v50_v29 = vld [vmem:[%s721_s3 + $0x10] sm:$0xff]  ;;  %v51_v31 = vld [vmem:[%s721_s3 + $0x18] sm:$0xff] }
   0x8   :  { %134 = vmatprep.subr.bf16.mxu1 %v41_v18  ;;  %v48_v27 = vld [vmem:[%s721_s3] sm:$0xff]  ;;  %v46_v28 = vpack.c.bf16 %v43_v25, %v42_v24  ;;  %64 = vperm.xlu1 %387, %v50_v29   ;;  %v44_v32 = vld [vmem:[%s720_s2 + $0x10] sm:$0xff]  ;;  %v45_v33 = vld [vmem:[%s720_s2 + $0x18] sm:$0xff] }
   0x9   :  { %54 = vperm.xlu0 %386, %v48_v27   ;;  %v47_v34 = vpack.c.bf16 %v45_v33, %v44_v32  ;;  %v185_v37 = vld [vmem:[%s722_s0] sm:$0xff]  ;;  %v187_v41 = vld [vmem:[%s722_s0 + $0x10] sm:$0xff]  ;;  %v186_v43 = vld [vmem:[%s722_s0 + $0x8] sm:$0xff] }
   0xa   :  { %82 = vmatpush1.bf16.msra.mxu0 %v38_v22  ;;  %v188_v47 = vld [vmem:[%s722_s0 + $0x18] sm:$0xff]  ;;  %v189_v49 = vld [vmem:[%s722_s0 + $0x20] sm:$0xff]  ;;  %v191_v62 = vld [vmem:[%s722_s0 + $0x30] sm:$0xff] }
   0xb   :  { %135 = vmatpush1.bf16.msra.mxu1 %v40_v26  ;;  %v190_v2 = vld [vmem:[%s722_s0 + $0x28] sm:$0xff]  ;;  %v192_v19 = vld [vmem:[%s722_s0 + $0x38] sm:$0xff] }
   0xc   :  { %69 = vperm.xlu1 %387, %v51_v31  }
   0xd   :  { %381 = vmatmul.mubr.msk.bf16.vlgmr.msra.gmra.mrb[0].mxu0 %vm72_vm0, %v46_v28  ;;  %59 = vperm.xlu0 %386, %v49_v30  }
   0xe   :  { %383 = vmatmul.mubr.msk.bf16.vlgmr.msra.gmra.mrb[0].mxu1 %vm72_vm0, %v46_v28  ;;  %121 = vmatprep.mubr.bf16.mxu0 %v420_v3 }
   0xf   :  { %174 = vmatprep.mubr.bf16.mxu1 %v420_v3 }
  0x15   :  { %382 = vmatmul.mubr.msk.bf16.gmra.mrb[4].mxu0 %vm72_vm0, %v47_v34 }
  0x16   :  { %384 = vmatmul.mubr.msk.bf16.gmra.mrb[4].mxu1 %vm72_vm0, %v47_v34 }
  0x88   :  { %v55_v35 = vpop.permute.xlu0 %54 }
  0x8c   :  { %v60_v38 = vpop.permute.xlu0 %59 }
  0xe0   :  { %v113_v36 = vpop.f32.mrb[0].mxu0 }
  0xe1   :  { %v114_v39 = vadd.f32 %v113_v36, %v55_v35  ;;  %v166_v40 = vpop.f32.mrb[0].mxu1  ;;  %v115_v42 = vpop.f32.mrb[1].mxu0 }
  0xe2   :  { %v167_v44 = vadd.f32 %v166_v40, %v55_v35  ;;  %v116_v45 = vadd.f32 %v115_v42, %v55_v35  ;;  %v168_v46 = vpop.f32.mrb[1].mxu1  ;;  %v117_v48 = vpop.f32.mrb[2].mxu0 }
  0xe3   :  { %v201_v50 = vadd.f32 %v185_v37, %v114_v39  ;;  %v169_v51 = vadd.f32 %v168_v46, %v55_v35  ;;  %v118_v52 = vadd.f32 %v117_v48, %v60_v38  ;;  %v170_v53 = vpop.f32.mrb[2].mxu1  ;;  %v119_v54 = vpop.f32.mrb[3].mxu0  ;;  %v193_v48 = vld [vmem:[%s722_s0 + $0x40] sm:$0xff] }
  0xe4   :  { %v203_v55 = vadd.f32 %v187_v41, %v167_v44  ;;  %v533_v56 = vadd.f32 %v186_v43, %v116_v45  ;;  %v171_v57 = vadd.f32 %v170_v53, %v60_v38  ;;  %v172_v58 = vpop.f32.mrb[3].mxu1  ;;  %v120_v63 = vadd.f32 %v119_v54, %v60_v38  ;;  %v65_v45 = vpop.permute.xlu1 %64  ;;  %v194_v53 = vld [vmem:[%s722_s0 + $0x48] sm:$0xff] }
  0xe5   :  { %v233_v59 = vmul.f32 0.044715, %v201_v50  ;;  %v535_v60 = vadd.f32 %v188_v47, %v169_v51  ;;  %v537_v61 = vadd.f32 %v189_v49, %v118_v52  ;;  %v173_v13 = vadd.f32 %v172_v58, %v60_v38  ;;  %v195_v49 = vld [vmem:[%s722_s0 + $0x50] sm:$0xff] }
  0xe6   :  { %v235_v0 = vmul.f32 0.044715, %v203_v55  ;;  %v234_v1 = vmul.f32 0.044715, %v533_v56  ;;  %v549_v8 = vadd.f32 %v191_v62, %v171_v57  ;;  %v552_v12 = vadd.f32 %v190_v2, %v120_v63 }
  0xe7   :  { %v249_v3 = vmul.f32 %v233_v59, %v201_v50  ;;  %v236_v4 = vmul.f32 0.044715, %v535_v60  ;;  %v237_v7 = vmul.f32 0.044715, %v537_v61  ;;  %v559_v22 = vmul.f32 0.5, %v201_v50 }
  0xe8   :  { %v251_v5 = vmul.f32 %v235_v0, %v203_v55  ;;  %v250_v6 = vmul.f32 %v234_v1, %v533_v56  ;;  %v123_v9 = vpop.f32.mrb[4].mxu0  ;;  %v239_v25 = vmul.f32 0.044715, %v549_v8  ;;  %v238_v31 = vmul.f32 0.044715, %v552_v12 }
  0xe9   :  { %v265_v10 = vmul.f32 %v249_v3, %v201_v50  ;;  %v252_v11 = vmul.f32 %v236_v4, %v535_v60  ;;  %v176_v14 = vpop.f32.mrb[4].mxu1  ;;  %v125_v15 = vpop.f32.mrb[5].mxu0  ;;  %v253_v18 = vmul.f32 %v237_v7, %v537_v61  ;;  %v574_v36 = vadd.f32 %v192_v19, %v173_v13  ;;  %v196_v3 = vld [vmem:[%s722_s0 + $0x58] sm:$0xff] }
  0xea   :  { %v267_v16 = vmul.f32 %v251_v5, %v203_v55  ;;  %v266_v17 = vmul.f32 %v250_v6, %v533_v56  ;;  %v178_v20 = vpop.f32.mrb[5].mxu1  ;;  %v127_v21 = vpop.f32.mrb[6].mxu0  ;;  %v255_v35 = vmul.f32 %v239_v25, %v549_v8  ;;  %v254_v40 = vmul.f32 %v238_v31, %v552_v12 }
  0xeb   :  { %v281_v23 = vadd.f32 %v265_v10, %v201_v50  ;;  %v268_v24 = vmul.f32 %v252_v11, %v535_v60  ;;  %v563_v26 = vpop.f32.mrb[6].mxu1  ;;  %v565_v27 = vpop.f32.mrb[7].mxu0  ;;  %v269_v30 = vmul.f32 %v253_v18, %v537_v61  ;;  %v578_v41 = vmul.f32 0.5, %v203_v55 }
  0xec   :  { %v283_v28 = vadd.f32 %v267_v16, %v203_v55  ;;  %v282_v29 = vadd.f32 %v266_v17, %v533_v56  ;;  %v570_v32 = vpop.f32.mrb[7].mxu1  ;;  %v271_v43 = vmul.f32 %v255_v35, %v549_v8  ;;  %v270_v46 = vmul.f32 %v254_v40, %v552_v12  ;;  %v610_v10 = vpop.permute.xlu1 %69 }
  0xed   :  { %v297_v33 = vmul.f32 0.7978846, %v281_v23  ;;  %v284_v34 = vadd.f32 %v268_v24, %v535_v60  ;;  %v285_v39 = vadd.f32 %v269_v30, %v537_v61  ;;  %v240_v47 = vmul.f32 0.044715, %v574_v36 }
  0xee   :  { %v299_v37 = vmul.f32 0.7978846, %v283_v28  ;;  %v298_v38 = vmul.f32 0.7978846, %v282_v29  ;;  %v287_v50 = vadd.f32 %v271_v43, %v549_v8  ;;  %v124_v51 = vadd.f32 %v123_v9, %v65_v45 }
  0xef   :  { %388 = vtanh.f32 %v297_v33  ;;  %v300_v42 = vmul.f32 0.7978846, %v284_v34  ;;  %v301_v44 = vmul.f32 0.7978846, %v285_v39  ;;  %v177_v52 = vadd.f32 %v176_v14, %v65_v45 }
  0xf0   :  { %390 = vtanh.f32 %v299_v37  ;;  %v286_v54 = vadd.f32 %v270_v46, %v552_v12  ;;  %v256_v55 = vmul.f32 %v240_v47, %v574_v36  ;;  %v126_v57 = vadd.f32 %v125_v15, %v65_v45 }
  0xf1   :  { %392 = vtanh.f32 %v298_v38  ;;  %v303_v58 = vmul.f32 0.7978846, %v287_v50  ;;  %v595_v59 = vadd.f32 %v193_v48, %v124_v51  ;;  %v597_v62 = vadd.f32 %v195_v49, %v177_v52  ;;  %v198_v52 = vld [vmem:[%s722_s0 + $0x68] sm:$0xff] }
  0xf2   :  { %394 = vtanh.f32 %v300_v42  ;;  %v302_v63 = vmul.f32 0.7978846, %v286_v54  ;;  %v272_v0 = vmul.f32 %v256_v55, %v574_v36  ;;  %v600_v1 = vadd.f32 %v194_v53, %v126_v57 }
  0xf3   :  { %396 = vtanh.f32 %v301_v44  ;;  %v179_v2 = vadd.f32 %v178_v20, %v65_v45  ;;  %v218_v4 = vmul.f32 0.5, %v533_v56  ;;  %v220_v5 = vmul.f32 0.5, %v535_v60  ;;  %v197_v60 = vld [vmem:[%s722_s0 + $0x60] sm:$0xff] }
  0xf4   :  { %398 = vtanh.f32 %v303_v58  ;;  %v241_v6 = vmul.f32 0.044715, %v595_v59  ;;  %v221_v7 = vmul.f32 0.5, %v537_v61  ;;  %v288_v9 = vadd.f32 %v272_v0, %v574_v36 }
  0xf5   :  { %400 = vtanh.f32 %v302_v63  ;;  %v243_v11 = vmul.f32 0.044715, %v597_v62  ;;  %v242_v14 = vmul.f32 0.044715, %v600_v1  ;;  %v615_v15 = vadd.f32 %v196_v3, %v179_v2  ;;  %v200_v2 = vld [vmem:[%s722_s0 + $0x78] sm:$0xff] }
  0xf6   :  { %v257_v13 = vmul.f32 %v241_v6, %v595_v59  ;;  %v128_v56 = vadd.f32 %v127_v21, %v610_v10  ;;  %v223_v61 = vmul.f32 0.5, %v549_v8  ;;  %v222_v16 = vmul.f32 0.5, %v552_v12 }
  0xf7   :  { %v304_v17 = vmul.f32 0.7978846, %v288_v9  ;;  %v259_v18 = vmul.f32 %v243_v11, %v597_v62  ;;  %v258_v23 = vmul.f32 %v242_v14, %v600_v1  ;;  %v244_v24 = vmul.f32 0.044715, %v615_v15 }
  0xf8   :  { %v273_v20 = vmul.f32 %v257_v13, %v595_v59  ;;  %v181_v21 = vadd.f32 %v563_v26, %v610_v10  ;;  %v630_v29 = vadd.f32 %v197_v60, %v128_v56  ;;  %v130_v39 = vadd.f32 %v565_v27, %v610_v10  ;;  %v199_v27 = vld [vmem:[%s722_s0 + $0x70] sm:$0xff] }
  0xf9   :  { %v389_v19 = vpop.eup %388  ;;  %402 = vtanh.f32 %v304_v17  ;;  %v275_v8 = vmul.f32 %v259_v18, %v597_v62  ;;  %v274_v33 = vmul.f32 %v258_v23, %v600_v1  ;;  %v260_v34 = vmul.f32 %v244_v24, %v615_v15 }
  0xfa   :  { %v391_v25 = vpop.eup %390  ;;  %v329_v28 = vadd.f32 1.0, %v389_v19  ;;  %v289_v31 = vadd.f32 %v273_v20, %v595_v59  ;;  %v245_v51 = vmul.f32 0.044715, %v630_v29  ;;  %v663_v0 = vadd.f32 %v199_v27, %v181_v21 }
  0xfb   :  { %v393_v12 = vpop.eup %392  ;;  %v331_v30 = vadd.f32 1.0, %v391_v25  ;;  %v291_v26 = vadd.f32 %v275_v8, %v597_v62  ;;  %v290_v45 = vadd.f32 %v274_v33, %v600_v1  ;;  %v276_v48 = vmul.f32 %v260_v34, %v615_v15 }
  0xfc   :  { %v395_v35 = vpop.eup %394  ;;  %v345_v37 = vmul.f32 %v329_v28, %v559_v22  ;;  %v330_v38 = vadd.f32 1.0, %v393_v12  ;;  %v305_v44 = vmul.f32 0.7978846, %v289_v31  ;;  %v261_v63 = vmul.f32 %v245_v51, %v630_v29 }
  0xfd   :  { %v397_v40 = vpop.eup %396  ;;  %v347_v42 = vmul.f32 %v331_v30, %v578_v41  ;;  %v332_v43 = vadd.f32 1.0, %v395_v35  ;;  %v307_v22 = vmul.f32 0.7978846, %v291_v26  ;;  %v306_v50 = vmul.f32 0.7978846, %v290_v45 }
  0xfe   :  { %361 = vst [vmem:[%s723_s4] sm:$0xff] %v345_v37  ;;  %v346_v46 = vmul.f32 %v330_v38, %v218_v4  ;;  %v333_v47 = vadd.f32 1.0, %v397_v40  ;;  %v399_v49 = vpop.eup %398  ;;  %404 = vtanh.f32 %v305_v44  ;;  %v292_v57 = vadd.f32 %v276_v48, %v615_v15 }
  0xff   :  { %363 = vst [vmem:[%s723_s4 + $0x10] sm:$0xff] %v347_v42  ;;  %v348_v41 = vmul.f32 %v332_v43, %v220_v5  ;;  %v401_v53 = vpop.eup %400  ;;  %v335_v55 = vadd.f32 1.0, %v399_v49  ;;  %406 = vtanh.f32 %v307_v22  ;;  %v214_v5 = vadd.f32 %v198_v52, %v130_v39 }
 0x100   :  { %362 = vst [vmem:[%s723_s4 + $0x8] sm:$0xff] %v346_v46  ;;  %v349_v54 = vmul.f32 %v333_v47, %v221_v7  ;;  %v334_v58 = vadd.f32 1.0, %v401_v53  ;;  %408 = vtanh.f32 %v306_v50  ;;  %v308_v4 = vmul.f32 0.7978846, %v292_v57 }
 0x101   :  { %364 = vst [vmem:[%s723_s4 + $0x18] sm:$0xff] %v348_v41  ;;  %v351_v3 = vmul.f32 %v335_v55, %v223_v61  ;;  %v183_v6 = vadd.f32 %v570_v32, %v610_v10  ;;  %v277_v9 = vmul.f32 %v261_v63, %v630_v29  ;;  %v247_v11 = vmul.f32 0.044715, %v663_v0 }
 0x102   :  { %365 = vst [vmem:[%s723_s4 + $0x20] sm:$0xff] %v349_v54  ;;  %v350_v7 = vmul.f32 %v334_v58, %v222_v16  ;;  %410 = vtanh.f32 %v308_v4  ;;  %v246_v14 = vmul.f32 0.044715, %v214_v5  ;;  %v224_v60 = vmul.f32 0.5, %v574_v36 }
 0x103   :  { %v403_v13 = vpop.eup %402  ;;  %367 = vst [vmem:[%s723_s4 + $0x30] sm:$0xff] %v351_v3  ;;  %v216_v56 = vadd.f32 %v200_v2, %v183_v6  ;;  %v293_v10 = vadd.f32 %v277_v9, %v630_v29  ;;  %v263_v61 = vmul.f32 %v247_v11, %v663_v0  ;;  %v225_v28 = vmul.f32 0.5, %v595_v59 }
 0x104   :  { %366 = vst [vmem:[%s723_s4 + $0x28] sm:$0xff] %v350_v7  ;;  %v336_v32 = vadd.f32 1.0, %v403_v13  ;;  %v262_v16 = vmul.f32 %v246_v14, %v214_v5  ;;  %v227_v33 = vmul.f32 0.5, %v597_v62  ;;  %v226_v35 = vmul.f32 0.5, %v600_v1 }
 0x105   :  { %v248_v17 = vmul.f32 0.044715, %v216_v56  ;;  %v309_v19 = vmul.f32 0.7978846, %v293_v10  ;;  %v279_v20 = vmul.f32 %v263_v61, %v663_v0  ;;  %v228_v62 = vmul.f32 0.5, %v615_v15 }
 0x106   :  { %v352_v18 = vmul.f32 %v336_v32, %v224_v60  ;;  %v278_v23 = vmul.f32 %v262_v16, %v214_v5  ;;  %v229_v47 = vmul.f32 0.5, %v630_v29  ;;  %v231_v15 = vmul.f32 0.5, %v663_v0 }
 0x107   :  { %v264_v24 = vmul.f32 %v248_v17, %v216_v56  ;;  %412 = vtanh.f32 %v309_v19  ;;  %v295_v36 = vadd.f32 %v279_v20, %v663_v0  ;;  %v230_v50 = vmul.f32 0.5, %v214_v5 }
 0x108   :  { %v405_v21 = vpop.eup %404  ;;  %368 = vst [vmem:[%s723_s4 + $0x38] sm:$0xff] %v352_v18  ;;  %v294_v12 = vadd.f32 %v278_v23, %v214_v5  ;;  %v232_v55 = vmul.f32 0.5, %v216_v56 }
 0x109   :  { %v407_v25 = vpop.eup %406  ;;  %v337_v8 = vadd.f32 1.0, %v405_v21  ;;  %v280_v30 = vmul.f32 %v264_v24, %v216_v56  ;;  %v311_v37 = vmul.f32 0.7978846, %v295_v36 }
 0x10a   :  { %v409_v31 = vpop.eup %408  ;;  %v339_v34 = vadd.f32 1.0, %v407_v25  ;;  %v310_v39 = vmul.f32 0.7978846, %v294_v12 }
 0x10b   :  { %v353_v38 = vmul.f32 %v337_v8, %v225_v28  ;;  %v338_v26 = vadd.f32 1.0, %v409_v31  ;;  %v296_v40 = vadd.f32 %v280_v30, %v216_v56  ;;  %414 = vtanh.f32 %v311_v37 }
 0x10c   :  { %v355_v42 = vmul.f32 %v339_v34, %v227_v33  ;;  %v411_v43 = vpop.eup %410  ;;  %416 = vtanh.f32 %v310_v39 }
 0x10d   :  { %369 = vst [vmem:[%s723_s4 + $0x40] sm:$0xff] %v353_v38  ;;  %v354_v59 = vmul.f32 %v338_v26, %v226_v35  ;;  %v312_v44 = vmul.f32 0.7978846, %v296_v40  ;;  %v340_v1 = vadd.f32 1.0, %v411_v43 }
 0x10e   :  { %371 = vst [vmem:[%s723_s4 + $0x50] sm:$0xff] %v355_v42 }
 0x10f   :  { %370 = vst [vmem:[%s723_s4 + $0x48] sm:$0xff] %v354_v59  ;;  %418 = vtanh.f32 %v312_v44  ;;  %v356_v45 = vmul.f32 %v340_v1, %v228_v62 }
 0x111   :  { %v413_v46 = vpop.eup %412  ;;  %372 = vst [vmem:[%s723_s4 + $0x58] sm:$0xff] %v356_v45 }
 0x112   :  { %v341_v22 = vadd.f32 1.0, %v413_v46 }
 0x114   :  { %v357_v48 = vmul.f32 %v341_v22, %v229_v47 }
 0x115   :  { %v415_v27 = vpop.eup %414 }
 0x116   :  { %v417_v49 = vpop.eup %416  ;;  %373 = vst [vmem:[%s723_s4 + $0x60] sm:$0xff] %v357_v48  ;;  %v343_v41 = vadd.f32 1.0, %v415_v27 }
 0x117   :  { %v342_v51 = vadd.f32 1.0, %v417_v49 }
 0x118   :  { %v359_v53 = vmul.f32 %v343_v41, %v231_v15 }
 0x119   :  { %v419_v52 = vpop.eup %418  ;;  %v358_v54 = vmul.f32 %v342_v51, %v230_v50 }
 0x11a   :  { %v344_v57 = vadd.f32 1.0, %v419_v52  ;;  %375 = vst [vmem:[%s723_s4 + $0x70] sm:$0xff] %v359_v53 }
 0x11b   :  { %374 = vst [vmem:[%s723_s4 + $0x68] sm:$0xff] %v358_v54 }
 0x11c   :  { %v360_v29 = vmul.f32 %v344_v57, %v232_v55 }
 0x11e   :  { %376 = vst [vmem:[%s723_s4 + $0x78] sm:$0xff] %v360_v29 }

// kernel: fno_forward_pallas.14
= control target key start
LH: loop header
LB: loop body
LE: loop exit
PB: predicated region body
PF: predicated region fallthrough
CT: control target
= control target key end

     0   :  { %v244_v3 = vmov 0   ;;  %vm72_vm0 = vcmask 261120   ;;  %s438_s1 = inlined_call_operand.vmem [shape: f32[32,512], index: 1, kind: input, shape index: {}]   ;;  %s439_s2 = inlined_call_operand.vmem [shape: f32[32,32], index: 2, kind: input, shape index: {}]   ;;  %s440_s3 = inlined_call_operand.vmem [shape: f32[32,1], index: 3, kind: input, shape index: {}]   ;;  %s441_s0 = inlined_call_operand.vmem [shape: f32[32,512], index: 0, kind: input, shape index: {}]   ;;  %s442_s4 = inlined_call_operand.vmem [shape: f32[32,512], index: 4, kind: output, shape index: {}]  }
   0x1   :  { %v19_v0 = vld [vmem:[%s438_s1 + $0x8] sm:$0xff]  ;;  %v21_v2 = vld [vmem:[%s438_s1 + $0x18] sm:$0xff]  ;;  %111 = vmatprep.mubr.bf16.mxu0 %v244_v3  ;;  %164 = vmatprep.mubr.bf16.mxu1 %v244_v3  ;;  %v18_v6 = vld [vmem:[%s438_s1] sm:$0xff] }
   0x2   :  { %v23_v1 = vld [vmem:[%s438_s1 + $0x28] sm:$0xff]  ;;  %v25_v5 = vld [vmem:[%s438_s1 + $0x38] sm:$0xff]  ;;  %v22_v7 = vld [vmem:[%s438_s1 + $0x20] sm:$0xff]  ;;  %242 = vset.pattern.permute.xlu0 %v244_v3  ;;  %243 = vset.pattern.permute.xlu1 %v244_v3 }
   0x3   :  { %v35_v4 = vpack.c.bf16 %v23_v1, %v19_v0  ;;  %v37_v8 = vpack.c.bf16 %v25_v5, %v21_v2  ;;  %v34_v9 = vpack.c.bf16 %v22_v7, %v18_v6  ;;  %v20_v10 = vld [vmem:[%s438_s1 + $0x10] sm:$0xff]  ;;  %v27_v12 = vld [vmem:[%s438_s1 + $0x48] sm:$0xff]  ;;  %v29_v15 = vld [vmem:[%s438_s1 + $0x58] sm:$0xff] }
   0x4   :  { %v24_v11 = vld [vmem:[%s438_s1 + $0x30] sm:$0xff]  ;;  %v31_v14 = vld [vmem:[%s438_s1 + $0x68] sm:$0xff]  ;;  %v33_v16 = vld [vmem:[%s438_s1 + $0x78] sm:$0xff] }
   0x5   :  { %79 = vmatprep.subr.bf16.mxu0 %v35_v4  ;;  %v36_v13 = vpack.c.bf16 %v24_v11, %v20_v10  ;;  %132 = vmatprep.subr.bf16.mxu1 %v37_v8  ;;  %v39_v17 = vpack.c.bf16 %v31_v14, %v27_v12  ;;  %v41_v18 = vpack.c.bf16 %v33_v16, %v29_v15  ;;  %v26_v19 = vld [vmem:[%s438_s1 + $0x40] sm:$0xff]  ;;  %v28_v21 = vld [vmem:[%s438_s1 + $0x50] sm:$0xff]  ;;  %v43_v25 = vld [vmem:[%s439_s2 + $0x8] sm:$0xff] }
   0x6   :  { %80 = vmatpush1.bf16.msra.mxu0 %v34_v9  ;;  %v30_v20 = vld [vmem:[%s438_s1 + $0x60] sm:$0xff]  ;;  %v32_v23 = vld [vmem:[%s438_s1 + $0x70] sm:$0xff]  ;;  %v49_v30 = vld [vmem:[%s440_s3 + $0x8] sm:$0xff] }
   0x7   :  { %133 = vmatpush1.bf16.msra.mxu1 %v36_v13  ;;  %v38_v22 = vpack.c.bf16 %v30_v20, %v26_v19  ;;  %v42_v24 = vld [vmem:[%s439_s2] sm:$0xff]  ;;  %81 = vmatprep.subr.bf16.mxu0 %v39_v17  ;;  %v40_v26 = vpack.c.bf16 %v32_v23, %v28_v21  ;;  %v50_v29 = vld [vmem:[%s440_s3 + $0x10] sm:$0xff]  ;;  %v51_v31 = vld [vmem:[%s440_s3 + $0x18] sm:$0xff] }
   0x8   :  { %134 = vmatprep.subr.bf16.mxu1 %v41_v18  ;;  %v48_v27 = vld [vmem:[%s440_s3] sm:$0xff]  ;;  %v46_v28 = vpack.c.bf16 %v43_v25, %v42_v24  ;;  %64 = vperm.xlu1 %243, %v50_v29   ;;  %v44_v32 = vld [vmem:[%s439_s2 + $0x10] sm:$0xff]  ;;  %v45_v33 = vld [vmem:[%s439_s2 + $0x18] sm:$0xff] }
   0x9   :  { %54 = vperm.xlu0 %242, %v48_v27   ;;  %v47_v34 = vpack.c.bf16 %v45_v33, %v44_v32  ;;  %v185_v38 = vld [vmem:[%s441_s0] sm:$0xff]  ;;  %v187_v42 = vld [vmem:[%s441_s0 + $0x10] sm:$0xff]  ;;  %v186_v44 = vld [vmem:[%s441_s0 + $0x8] sm:$0xff] }
   0xa   :  { %82 = vmatpush1.bf16.msra.mxu0 %v38_v22  ;;  %v188_v48 = vld [vmem:[%s441_s0 + $0x18] sm:$0xff]  ;;  %v189_v50 = vld [vmem:[%s441_s0 + $0x20] sm:$0xff]  ;;  %v191_v55 = vld [vmem:[%s441_s0 + $0x30] sm:$0xff] }
   0xb   :  { %135 = vmatpush1.bf16.msra.mxu1 %v40_v26  ;;  %v190_v57 = vld [vmem:[%s441_s0 + $0x28] sm:$0xff]  ;;  %v192_v63 = vld [vmem:[%s441_s0 + $0x38] sm:$0xff]  ;;  %v193_v8 = vld [vmem:[%s441_s0 + $0x40] sm:$0xff] }
   0xc   :  { %69 = vperm.xlu1 %243, %v51_v31   ;;  %v195_v11 = vld [vmem:[%s441_s0 + $0x50] sm:$0xff]  ;;  %v194_v13 = vld [vmem:[%s441_s0 + $0x48] sm:$0xff]  ;;  %v196_v17 = vld [vmem:[%s441_s0 + $0x58] sm:$0xff] }
   0xd   :  { %237 = vmatmul.mubr.msk.bf16.vlgmr.msra.gmra.mrb[0].mxu0 %vm72_vm0, %v46_v28  ;;  %59 = vperm.xlu0 %242, %v49_v30   ;;  %v197_v19 = vld [vmem:[%s441_s0 + $0x60] sm:$0xff]  ;;  %v199_v24 = vld [vmem:[%s441_s0 + $0x70] sm:$0xff]  ;;  %v198_v26 = vld [vmem:[%s441_s0 + $0x68] sm:$0xff] }
   0xe   :  { %239 = vmatmul.mubr.msk.bf16.vlgmr.msra.gmra.mrb[0].mxu1 %vm72_vm0, %v46_v28  ;;  %121 = vmatprep.mubr.bf16.mxu0 %v244_v3  ;;  %v200_v32 = vld [vmem:[%s441_s0 + $0x78] sm:$0xff] }
   0xf   :  { %174 = vmatprep.mubr.bf16.mxu1 %v244_v3 }
  0x15   :  { %238 = vmatmul.mubr.msk.bf16.gmra.mrb[4].mxu0 %vm72_vm0, %v47_v34 }
  0x16   :  { %240 = vmatmul.mubr.msk.bf16.gmra.mrb[4].mxu1 %vm72_vm0, %v47_v34 }
  0x87   :  { %v65_v36 = vpop.permute.xlu1 %64 }
  0x88   :  { %v55_v35 = vpop.permute.xlu0 %54 }
  0x8b   :  { %v70_v6 = vpop.permute.xlu1 %69 }
  0x8c   :  { %v60_v39 = vpop.permute.xlu0 %59 }
  0xe0   :  { %v113_v37 = vpop.f32.mrb[0].mxu0 }
  0xe1   :  { %v114_v40 = vadd.f32 %v113_v37, %v55_v35  ;;  %v166_v41 = vpop.f32.mrb[0].mxu1  ;;  %v115_v43 = vpop.f32.mrb[1].mxu0 }
  0xe2   :  { %v167_v45 = vadd.f32 %v166_v41, %v55_v35  ;;  %v116_v46 = vadd.f32 %v115_v43, %v55_v35  ;;  %v168_v47 = vpop.f32.mrb[1].mxu1  ;;  %v117_v49 = vpop.f32.mrb[2].mxu0 }
  0xe3   :  { %v201_v51 = vadd.f32 %v185_v38, %v114_v40  ;;  %v169_v52 = vadd.f32 %v168_v47, %v55_v35  ;;  %v118_v53 = vadd.f32 %v117_v49, %v60_v39  ;;  %v170_v54 = vpop.f32.mrb[2].mxu1  ;;  %v119_v56 = vpop.f32.mrb[3].mxu0 }
  0xe4   :  { %v203_v58 = vadd.f32 %v187_v42, %v167_v45  ;;  %v202_v59 = vadd.f32 %v186_v44, %v116_v46  ;;  %v171_v60 = vadd.f32 %v170_v54, %v60_v39  ;;  %v120_v61 = vadd.f32 %v119_v56, %v60_v39  ;;  %v172_v62 = vpop.f32.mrb[3].mxu1 }
  0xe5   :  { %217 = vst [vmem:[%s442_s4] sm:$0xff] %v201_v51  ;;  %v204_v0 = vadd.f32 %v188_v48, %v169_v52  ;;  %v205_v1 = vadd.f32 %v189_v50, %v118_v53  ;;  %v173_v2 = vadd.f32 %v172_v62, %v60_v39 }
  0xe6   :  { %219 = vst [vmem:[%s442_s4 + $0x10] sm:$0xff] %v203_v58  ;;  %218 = vst [vmem:[%s442_s4 + $0x8] sm:$0xff] %v202_v59  ;;  %v207_v3 = vadd.f32 %v191_v55, %v171_v60  ;;  %v206_v4 = vadd.f32 %v190_v57, %v120_v61 }
  0xe7   :  { %220 = vst [vmem:[%s442_s4 + $0x18] sm:$0xff] %v204_v0  ;;  %221 = vst [vmem:[%s442_s4 + $0x20] sm:$0xff] %v205_v1  ;;  %v208_v5 = vadd.f32 %v192_v63, %v173_v2 }
  0xe8   :  { %223 = vst [vmem:[%s442_s4 + $0x30] sm:$0xff] %v207_v3  ;;  %222 = vst [vmem:[%s442_s4 + $0x28] sm:$0xff] %v206_v4  ;;  %v123_v7 = vpop.f32.mrb[4].mxu0 }
  0xe9   :  { %224 = vst [vmem:[%s442_s4 + $0x38] sm:$0xff] %v208_v5  ;;  %v124_v9 = vadd.f32 %v123_v7, %v65_v36  ;;  %v176_v10 = vpop.f32.mrb[4].mxu1  ;;  %v125_v12 = vpop.f32.mrb[5].mxu0 }
  0xea   :  { %v177_v14 = vadd.f32 %v176_v10, %v65_v36  ;;  %v126_v15 = vadd.f32 %v125_v12, %v65_v36  ;;  %v178_v16 = vpop.f32.mrb[5].mxu1  ;;  %v127_v18 = vpop.f32.mrb[6].mxu0 }
  0xeb   :  { %v209_v20 = vadd.f32 %v193_v8, %v124_v9  ;;  %v179_v21 = vadd.f32 %v178_v16, %v65_v36  ;;  %v128_v22 = vadd.f32 %v127_v18, %v70_v6  ;;  %v180_v23 = vpop.f32.mrb[6].mxu1  ;;  %v129_v25 = vpop.f32.mrb[7].mxu0 }
  0xec   :  { %v211_v27 = vadd.f32 %v195_v11, %v177_v14  ;;  %v210_v28 = vadd.f32 %v194_v13, %v126_v15  ;;  %v181_v29 = vadd.f32 %v180_v23, %v70_v6  ;;  %v130_v30 = vadd.f32 %v129_v25, %v70_v6  ;;  %v182_v31 = vpop.f32.mrb[7].mxu1 }
  0xed   :  { %225 = vst [vmem:[%s442_s4 + $0x40] sm:$0xff] %v209_v20  ;;  %v212_v33 = vadd.f32 %v196_v17, %v179_v21  ;;  %v213_v34 = vadd.f32 %v197_v19, %v128_v22  ;;  %v183_v35 = vadd.f32 %v182_v31, %v70_v6 }
  0xee   :  { %227 = vst [vmem:[%s442_s4 + $0x50] sm:$0xff] %v211_v27  ;;  %226 = vst [vmem:[%s442_s4 + $0x48] sm:$0xff] %v210_v28  ;;  %v215_v36 = vadd.f32 %v199_v24, %v181_v29  ;;  %v214_v37 = vadd.f32 %v198_v26, %v130_v30 }
  0xef   :  { %228 = vst [vmem:[%s442_s4 + $0x58] sm:$0xff] %v212_v33  ;;  %229 = vst [vmem:[%s442_s4 + $0x60] sm:$0xff] %v213_v34  ;;  %v216_v38 = vadd.f32 %v200_v32, %v183_v35 }
  0xf0   :  { %231 = vst [vmem:[%s442_s4 + $0x70] sm:$0xff] %v215_v36  ;;  %230 = vst [vmem:[%s442_s4 + $0x68] sm:$0xff] %v214_v37 }
  0xf1   :  { %232 = vst [vmem:[%s442_s4 + $0x78] sm:$0xff] %v216_v38 }

// kernel: fno_forward_pallas.15
= control target key start
LH: loop header
LB: loop body
LE: loop exit
PB: predicated region body
PF: predicated region fallthrough
CT: control target
= control target key end

     0   :  { %v519_v3 = vmov 0   ;;  %vm77_vm0 = vcmask 261120   ;;  %s762_s0 = inlined_call_operand.vmem [shape: f32[32,512], index: 0, kind: input, shape index: {}]   ;;  %s763_s4 = inlined_call_operand.<no memory space> [shape: f32[1,1], index: 4, kind: input, shape index: {}]   ;;  %s764_s1 = inlined_call_operand.vmem [shape: f32[32,32], index: 1, kind: input, shape index: {}]   ;;  %s765_s2 = inlined_call_operand.vmem [shape: f32[32,1], index: 2, kind: input, shape index: {}]   ;;  %s766_s3 = inlined_call_operand.vmem [shape: f32[1,32], index: 3, kind: input, shape index: {}]   ;;  %s767_s5 = inlined_call_operand.vmem [shape: f32[1,512], index: 5, kind: output, shape index: {}]  }
   0x1   :  { %v24_v0 = vld [vmem:[%s762_s0 + $0x8] sm:$0xff]  ;;  %v26_v2 = vld [vmem:[%s762_s0 + $0x18] sm:$0xff]  ;;  %116 = vmatprep.mubr.bf16.mxu0 %v519_v3  ;;  %169 = vmatprep.mubr.bf16.mxu1 %v519_v3  ;;  %v10_v4 = vstv %s763_s4  ;;  %v23_v7 = vld [vmem:[%s762_s0] sm:$0xff] }
   0x2   :  { %v28_v1 = vld [vmem:[%s762_s0 + $0x28] sm:$0xff]  ;;  %v30_v6 = vld [vmem:[%s762_s0 + $0x38] sm:$0xff]  ;;  %v27_v8 = vld [vmem:[%s762_s0 + $0x20] sm:$0xff]  ;;  %485 = vset.pattern.permute.xlu0 %v519_v3  ;;  %11 = vst [vmem:[#allocation2] sm:$0x1] %v10_v4  ;;  %486 = vset.pattern.permute.xlu1 %v519_v3 }
   0x3   :  { %v40_v5 = vpack.c.bf16 %v28_v1, %v24_v0  ;;  %v42_v9 = vpack.c.bf16 %v30_v6, %v26_v2  ;;  %v39_v10 = vpack.c.bf16 %v27_v8, %v23_v7  ;;  %v25_v11 = vld [vmem:[%s762_s0 + $0x10] sm:$0xff]  ;;  %v32_v13 = vld [vmem:[%s762_s0 + $0x48] sm:$0xff]  ;;  %v34_v16 = vld [vmem:[%s762_s0 + $0x58] sm:$0xff] }
   0x4   :  { %v29_v12 = vld [vmem:[%s762_s0 + $0x30] sm:$0xff]  ;;  %v36_v15 = vld [vmem:[%s762_s0 + $0x68] sm:$0xff]  ;;  %v38_v17 = vld [vmem:[%s762_s0 + $0x78] sm:$0xff] }
   0x5   :  { %84 = vmatprep.subr.bf16.mxu0 %v40_v5  ;;  %v41_v14 = vpack.c.bf16 %v29_v12, %v25_v11  ;;  %137 = vmatprep.subr.bf16.mxu1 %v42_v9  ;;  %v44_v18 = vpack.c.bf16 %v36_v15, %v32_v13  ;;  %v46_v19 = vpack.c.bf16 %v38_v17, %v34_v16  ;;  %v31_v20 = vld [vmem:[%s762_s0 + $0x40] sm:$0xff]  ;;  %v33_v22 = vld [vmem:[%s762_s0 + $0x50] sm:$0xff]  ;;  %v48_v26 = vld [vmem:[%s764_s1 + $0x8] sm:$0xff] }
   0x6   :  { %85 = vmatpush1.bf16.msra.mxu0 %v39_v10  ;;  %v35_v21 = vld [vmem:[%s762_s0 + $0x60] sm:$0xff]  ;;  %v37_v24 = vld [vmem:[%s762_s0 + $0x70] sm:$0xff]  ;;  %v54_v31 = vld [vmem:[%s765_s2 + $0x8] sm:$0xff] }
   0x7   :  { %138 = vmatpush1.bf16.msra.mxu1 %v41_v14  ;;  %v43_v23 = vpack.c.bf16 %v35_v21, %v31_v20  ;;  %v47_v25 = vld [vmem:[%s764_s1] sm:$0xff]  ;;  %86 = vmatprep.subr.bf16.mxu0 %v44_v18  ;;  %v45_v27 = vpack.c.bf16 %v37_v24, %v33_v22  ;;  %v55_v30 = vld [vmem:[%s765_s2 + $0x10] sm:$0xff]  ;;  %v56_v32 = vld [vmem:[%s765_s2 + $0x18] sm:$0xff] }
   0x8   :  { %139 = vmatprep.subr.bf16.mxu1 %v46_v19  ;;  %v53_v28 = vld [vmem:[%s765_s2] sm:$0xff]  ;;  %v51_v29 = vpack.c.bf16 %v48_v26, %v47_v25  ;;  %69 = vperm.xlu1 %486, %v55_v30   ;;  %v49_v33 = vld [vmem:[%s764_s1 + $0x10] sm:$0xff]  ;;  %v50_v34 = vld [vmem:[%s764_s1 + $0x18] sm:$0xff] }
   0x9   :  { %59 = vperm.xlu0 %485, %v53_v28   ;;  %v344_v35 = vld [vmem:[#allocation2] sm:$0x1]  ;;  %v52_v36 = vpack.c.bf16 %v50_v34, %v49_v33 }
   0xa   :  { %87 = vmatpush1.bf16.msra.mxu0 %v43_v23 }
   0xb   :  { %140 = vmatpush1.bf16.msra.mxu1 %v45_v27 }
   0xc   :  { %74 = vperm.xlu1 %486, %v56_v32  }
   0xd   :  { %477 = vmatmul.mubr.msk.bf16.vlgmr.msra.gmra.mrb[0].mxu0 %vm77_vm0, %v51_v29  ;;  %64 = vperm.xlu0 %485, %v54_v31  }
   0xe   :  { %479 = vmatmul.mubr.msk.bf16.vlgmr.msra.gmra.mrb[0].mxu1 %vm77_vm0, %v51_v29  ;;  %126 = vmatprep.mubr.bf16.mxu0 %v519_v3 }
   0xf   :  { %179 = vmatprep.mubr.bf16.mxu1 %v519_v3 }
  0x11   :  { %347 = vperm.xlu0 %485, %v344_v35  }
  0x15   :  { %478 = vmatmul.mubr.msk.bf16.gmra.mrb[4].mxu0 %vm77_vm0, %v52_v36 }
  0x16   :  { %480 = vmatmul.mubr.msk.bf16.gmra.mrb[4].mxu1 %vm77_vm0, %v52_v36  ;;  %389 = vmatprep.mubr.bf16.mxu0 %v519_v3 }
  0x17   :  { %430 = vmatprep.mubr.bf16.mxu1 %v519_v3 }
  0x87   :  { %v70_v4 = vpop.permute.xlu1 %69 }
  0x88   :  { %v60_v37 = vpop.permute.xlu0 %59 }
  0x8b   :  { %v75_v34 = vpop.permute.xlu1 %74 }
  0x8c   :  { %v65_v38 = vpop.permute.xlu0 %64 }
  0xe0   :  { %v118_v39 = vpop.f32.mrb[0].mxu0 }
  0xe1   :  { %v630_v40 = vadd.f32 %v118_v39, %v60_v37  ;;  %v171_v41 = vpop.f32.mrb[0].mxu1  ;;  %v120_v42 = vpop.f32.mrb[1].mxu0 }
  0xe2   :  { %v632_v43 = vadd.f32 %v171_v41, %v60_v37  ;;  %v634_v44 = vadd.f32 %v120_v42, %v60_v37  ;;  %v173_v45 = vpop.f32.mrb[1].mxu1  ;;  %v122_v46 = vpop.f32.mrb[2].mxu0 }
  0xe3   :  { %v206_v47 = vmul.f32 0.044715, %v630_v40  ;;  %v637_v48 = vadd.f32 %v173_v45, %v60_v37  ;;  %v639_v49 = vadd.f32 %v122_v46, %v65_v38  ;;  %v175_v50 = vpop.f32.mrb[2].mxu1  ;;  %v124_v51 = vpop.f32.mrb[3].mxu0 }
  0xe4   :  { %v208_v52 = vmul.f32 0.044715, %v632_v43  ;;  %v207_v53 = vmul.f32 0.044715, %v634_v44  ;;  %v643_v54 = vadd.f32 %v175_v50, %v65_v38  ;;  %v177_v55 = vpop.f32.mrb[3].mxu1  ;;  %v648_v59 = vadd.f32 %v124_v51, %v65_v38 }
  0xe5   :  { %v222_v56 = vmul.f32 %v206_v47, %v630_v40  ;;  %v209_v57 = vmul.f32 0.044715, %v637_v48  ;;  %v210_v58 = vmul.f32 0.044715, %v639_v49  ;;  %v652_v62 = vadd.f32 %v177_v55, %v65_v38 }
  0xe6   :  { %v224_v60 = vmul.f32 %v208_v52, %v632_v43  ;;  %v212_v61 = vmul.f32 0.044715, %v643_v54  ;;  %v223_v0 = vmul.f32 %v207_v53, %v634_v44  ;;  %v211_v9 = vmul.f32 0.044715, %v648_v59 }
  0xe7   :  { %v238_v63 = vmul.f32 %v222_v56, %v630_v40  ;;  %v226_v1 = vmul.f32 %v210_v58, %v639_v49  ;;  %v225_v7 = vmul.f32 %v209_v57, %v637_v48  ;;  %v213_v14 = vmul.f32 0.044715, %v652_v62 }
  0xe8   :  { %v240_v2 = vmul.f32 %v224_v60, %v632_v43  ;;  %v228_v3 = vmul.f32 %v212_v61, %v643_v54  ;;  %v128_v5 = vpop.f32.mrb[4].mxu0  ;;  %v239_v19 = vmul.f32 %v223_v0, %v634_v44  ;;  %v227_v30 = vmul.f32 %v211_v9, %v648_v59 }
  0xe9   :  { %v254_v6 = vadd.f32 %v238_v63, %v630_v40  ;;  %v242_v8 = vmul.f32 %v226_v1, %v639_v49  ;;  %v181_v10 = vpop.f32.mrb[4].mxu1  ;;  %v130_v11 = vpop.f32.mrb[5].mxu0  ;;  %v666_v15 = vadd.f32 %v128_v5, %v70_v4  ;;  %v229_v37 = vmul.f32 %v213_v14, %v652_v62 }
  0xea   :  { %v256_v12 = vadd.f32 %v240_v2, %v632_v43  ;;  %v244_v13 = vmul.f32 %v228_v3, %v643_v54  ;;  %v183_v16 = vpop.f32.mrb[5].mxu1  ;;  %v132_v17 = vpop.f32.mrb[6].mxu0  ;;  %v670_v21 = vadd.f32 %v181_v10, %v70_v4  ;;  %v674_v27 = vadd.f32 %v130_v11, %v70_v4 }
  0xeb   :  { %v270_v18 = vmul.f32 0.7978846, %v254_v6  ;;  %v258_v20 = vadd.f32 %v242_v8, %v639_v49  ;;  %v185_v22 = vpop.f32.mrb[6].mxu1  ;;  %v134_v23 = vpop.f32.mrb[7].mxu0  ;;  %v214_v26 = vmul.f32 0.044715, %v666_v15  ;;  %v678_v32 = vadd.f32 %v183_v16, %v70_v4 }
  0xec   :  { %v272_v24 = vmul.f32 0.7978846, %v256_v12  ;;  %v260_v25 = vadd.f32 %v244_v13, %v643_v54  ;;  %v187_v28 = vpop.f32.mrb[7].mxu1  ;;  %v216_v31 = vmul.f32 0.044715, %v670_v21  ;;  %v684_v39 = vadd.f32 %v132_v17, %v75_v34 }
  0xed   :  { %v274_v29 = vmul.f32 0.7978846, %v258_v20  ;;  %487 = vtanh.f32 %v270_v18  ;;  %v230_v35 = vmul.f32 %v214_v26, %v666_v15  ;;  %v215_v36 = vmul.f32 0.044715, %v674_v27 }
  0xee   :  { %v276_v33 = vmul.f32 0.7978846, %v260_v25  ;;  %v232_v38 = vmul.f32 %v216_v31, %v670_v21  ;;  %v217_v42 = vmul.f32 0.044715, %v678_v32  ;;  %v688_v45 = vadd.f32 %v185_v22, %v75_v34 }
  0xef   :  { %489 = vtanh.f32 %v274_v29  ;;  %v246_v41 = vmul.f32 %v230_v35, %v666_v15  ;;  %v218_v47 = vmul.f32 0.044715, %v684_v39  ;;  %v692_v50 = vadd.f32 %v134_v23, %v75_v34 }
  0xf0   :  { %491 = vtanh.f32 %v272_v24  ;;  %v248_v46 = vmul.f32 %v232_v38, %v670_v21  ;;  %v231_v52 = vmul.f32 %v215_v36, %v674_v27  ;;  %v220_v53 = vmul.f32 0.044715, %v688_v45 }
  0xf1   :  { %493 = vtanh.f32 %v276_v33  ;;  %v262_v51 = vadd.f32 %v246_v41, %v666_v15  ;;  %v697_v55 = vadd.f32 %v187_v28, %v75_v34  ;;  %v243_v56 = vmul.f32 %v227_v30, %v648_v59 }
  0xf2   :  { %v264_v57 = vadd.f32 %v248_v46, %v670_v21  ;;  %v234_v58 = vmul.f32 %v218_v47, %v684_v39  ;;  %v219_v60 = vmul.f32 0.044715, %v692_v50  ;;  %v236_v63 = vmul.f32 %v220_v53, %v688_v45 }
  0xf3   :  { %v278_v61 = vmul.f32 0.7978846, %v262_v51  ;;  %v221_v0 = vmul.f32 0.044715, %v697_v55  ;;  %v190_v1 = vmul.f32 0.5, %v630_v40  ;;  %v241_v2 = vmul.f32 %v225_v7, %v637_v48 }
  0xf4   :  { %v280_v3 = vmul.f32 0.7978846, %v264_v57  ;;  %v233_v4 = vmul.f32 %v217_v42, %v678_v32  ;;  %v250_v5 = vmul.f32 %v234_v58, %v684_v39  ;;  %v245_v6 = vmul.f32 %v229_v37, %v652_v62 }
  0xf5   :  { %v247_v8 = vmul.f32 %v231_v52, %v674_v27  ;;  %v252_v9 = vmul.f32 %v236_v63, %v688_v45  ;;  %v255_v10 = vadd.f32 %v239_v19, %v634_v44  ;;  %495 = vtanh.f32 %v278_v61 }
  0xf6   :  { %v266_v11 = vadd.f32 %v250_v5, %v684_v39  ;;  %v235_v40 = vmul.f32 %v219_v60, %v692_v50  ;;  %v259_v7 = vadd.f32 %v243_v56, %v648_v59  ;;  %497 = vtanh.f32 %v280_v3 }
  0xf7   :  { %v488_v12 = vpop.eup %487  ;;  %v268_v13 = vadd.f32 %v252_v9, %v688_v45  ;;  %v237_v14 = vmul.f32 %v221_v0, %v697_v55  ;;  %v271_v16 = vmul.f32 0.7978846, %v255_v10  ;;  %v249_v18 = vmul.f32 %v233_v4, %v678_v32 }
  0xf8   :  { %v282_v20 = vmul.f32 0.7978846, %v266_v11  ;;  %v275_v22 = vmul.f32 0.7978846, %v259_v7  ;;  %v257_v19 = vadd.f32 %v241_v2, %v637_v48  ;;  %v261_v25 = vadd.f32 %v245_v6, %v652_v62 }
  0xf9   :  { %v490_v17 = vpop.eup %489  ;;  %v284_v24 = vmul.f32 0.7978846, %v268_v13  ;;  %499 = vtanh.f32 %v271_v16  ;;  %v194_v26 = vmul.f32 0.5, %v639_v49  ;;  %v302_v30 = vadd.f32 1.0, %v488_v12 }
  0xfa   :  { %v492_v23 = vpop.eup %491  ;;  %501 = vtanh.f32 %v282_v20  ;;  %v273_v29 = vmul.f32 0.7978846, %v257_v19  ;;  %v306_v31 = vadd.f32 1.0, %v490_v17  ;;  %v251_v33 = vmul.f32 %v235_v40, %v692_v50 }
  0xfb   :  { %v494_v28 = vpop.eup %493  ;;  %503 = vtanh.f32 %v284_v24  ;;  %v253_v34 = vmul.f32 %v237_v14, %v697_v55  ;;  %v277_v35 = vmul.f32 0.7978846, %v261_v25  ;;  %v724_v36 = vmul.f32 %v302_v30, %v190_v1 }
  0xfc   :  { %505 = vtanh.f32 %v275_v22  ;;  %v726_v37 = vmul.f32 %v306_v31, %v194_v26  ;;  %v304_v38 = vadd.f32 1.0, %v492_v23  ;;  %v192_v49 = vmul.f32 0.5, %v632_v43 }
  0xfd   :  { %507 = vtanh.f32 %v273_v29  ;;  %v196_v41 = vmul.f32 0.5, %v643_v54  ;;  %v308_v42 = vadd.f32 1.0, %v494_v28  ;;  %v263_v47 = vadd.f32 %v247_v8, %v674_v27 }
  0xfe   :  { %509 = vtanh.f32 %v277_v35  ;;  %v336_v46 = vpack.c.bf16 %v726_v37, %v724_v36  ;;  %v733_v51 = vmul.f32 %v304_v38, %v192_v49  ;;  %v267_v53 = vadd.f32 %v251_v33, %v692_v50 }
  0xff   :  { %v735_v52 = vmul.f32 %v308_v42, %v196_v41  ;;  %v496_v56 = vpop.eup %495  ;;  %v279_v57 = vmul.f32 0.7978846, %v263_v47  ;;  %v265_v58 = vadd.f32 %v249_v18, %v678_v32  ;;  %v269_v43 = vadd.f32 %v253_v34, %v697_v55 }
 0x100   :  { %v498_v54 = vpop.eup %497  ;;  %v283_v61 = vmul.f32 0.7978846, %v267_v53  ;;  %v310_v2 = vadd.f32 1.0, %v496_v56  ;;  %v191_v4 = vmul.f32 0.5, %v634_v44  ;;  %v198_v5 = vmul.f32 0.5, %v666_v15 }
 0x101   :  { %v338_v60 = vpack.c.bf16 %v735_v52, %v733_v51  ;;  %511 = vtanh.f32 %v279_v57  ;;  %v281_v63 = vmul.f32 0.7978846, %v265_v58  ;;  %v285_v0 = vmul.f32 0.7978846, %v269_v43 }
 0x102   :  { %513 = vtanh.f32 %v283_v61  ;;  %v312_v6 = vadd.f32 1.0, %v498_v54  ;;  %v202_v10 = vmul.f32 0.5, %v684_v39  ;;  %v195_v7 = vmul.f32 0.5, %v648_v59  ;;  %v348_v54 = vpop.permute.xlu0 %347 }
 0x103   :  { %v500_v1 = vpop.eup %499  ;;  %515 = vtanh.f32 %v281_v63  ;;  %v200_v12 = vmul.f32 0.5, %v670_v21  ;;  %v204_v13 = vmul.f32 0.5, %v688_v45  ;;  %v193_v17 = vmul.f32 0.5, %v637_v48 }
 0x104   :  { %v502_v3 = vpop.eup %501  ;;  %v303_v9 = vadd.f32 1.0, %v500_v1  ;;  %517 = vtanh.f32 %v285_v0  ;;  %v326_v15 = vmul.f32 %v310_v2, %v198_v5  ;;  %v197_v22 = vmul.f32 0.5, %v652_v62 }
 0x105   :  { %v504_v8 = vpop.eup %503  ;;  %v314_v11 = vadd.f32 1.0, %v502_v3  ;;  %v328_v39 = vmul.f32 %v312_v6, %v200_v12  ;;  %v199_v62 = vmul.f32 0.5, %v674_v27  ;;  %v203_v35 = vmul.f32 0.5, %v692_v50 }
 0x106   :  { %v506_v40 = vpop.eup %505  ;;  %v316_v14 = vadd.f32 1.0, %v504_v8  ;;  %v319_v24 = vmul.f32 %v303_v9, %v191_v4  ;;  %v201_v38 = vmul.f32 0.5, %v678_v32  ;;  %v205_v47 = vmul.f32 0.5, %v697_v55 }
 0x107   :  { %v508_v16 = vpop.eup %507  ;;  %v307_v44 = vadd.f32 1.0, %v506_v40  ;;  %v330_v18 = vmul.f32 %v314_v11, %v202_v10  ;;  %v350_v32 = vlaneseq  ;;  %v520_v57 = vmov 1966171168  }
 0x108   :  { %v510_v20 = vpop.eup %509  ;;  %v305_v19 = vadd.f32 1.0, %v508_v16  ;;  %v332_v23 = vmul.f32 %v316_v14, %v204_v13  ;;  %v446_v58 = vunpack.c.l.s4 %v520_v57 }
 0x109   :  { %v323_v25 = vmul.f32 %v307_v44, %v195_v7  ;;  %v309_v59 = vadd.f32 1.0, %v510_v20  ;;  %v340_v26 = vpack.c.bf16 %v330_v18, %v326_v15  ;;  %v351_v55 = vshrl.u32 %v350_v32, 7 }
 0x10a   :  { %v342_v21 = vpack.c.bf16 %v332_v23, %v328_v39  ;;  %v321_v45 = vmul.f32 %v305_v19, %v193_v17  ;;  %vm470_vm1 = vcmp.lt.s32.totalorder %v350_v32, 512 }
 0x10b   :  { %v337_v28 = vpack.c.bf16 %v323_v25, %v319_v24  ;;  %v325_v29 = vmul.f32 %v309_v59, %v197_v22  ;;  %v512_v30 = vpop.eup %511  ;;  %v352_v43 = vsub.s32 0, %v351_v55 }
 0x10c   :  { %v514_v31 = vpop.eup %513  ;;  %v311_v33 = vadd.f32 1.0, %v512_v30 }
 0x10d   :  { %357 = vmatprep.subr.bf16.mxu0 %v337_v28  ;;  %v339_v48 = vpack.c.bf16 %v325_v29, %v321_v45  ;;  %v516_v34 = vpop.eup %515  ;;  %v315_v36 = vadd.f32 1.0, %v514_v31  ;;  %v353_v61 = vrot.slane %v348_v54, %v352_v43 }
 0x10e   :  { %358 = vmatpush1.bf16.msra.mxu0 %v336_v46  ;;  %v518_v37 = vpop.eup %517  ;;  %v313_v49 = vadd.f32 1.0, %v516_v34  ;;  %v327_v41 = vmul.f32 %v311_v33, %v199_v62  ;;  %v334_v46 = vld [vmem:[%s766_s3] sm:$0x1] }
 0x10f   :  { %398 = vmatprep.subr.bf16.mxu1 %v339_v48  ;;  %v331_v42 = vmul.f32 %v315_v36, %v203_v35  ;;  %v317_v51 = vadd.f32 1.0, %v518_v37  ;;  %v335_v56 = vpack.c.bf16 %v334_v46, %v334_v46 }
 0x110   :  { %399 = vmatpush1.bf16.msra.mxu1 %v338_v60  ;;  %v329_v27 = vmul.f32 %v313_v49, %v201_v38  ;;  %v447_v60 = vunpack.c.0.s8 %v446_v58 }
 0x111   :  { %v341_v52 = vpack.c.bf16 %v331_v42, %v327_v41  ;;  %v333_v53 = vmul.f32 %v317_v51, %v205_v47 }
 0x112   :  { %v450_v2 = vsub.s32 %v447_v60, %v351_v55 }
 0x113   :  { %359 = vmatprep.subr.bf16.mxu0 %v341_v52  ;;  %v343_v50 = vpack.c.bf16 %v333_v53, %v329_v27 }
 0x114   :  { %360 = vmatpush1.bf16.msra.mxu0 %v340_v26 }
 0x115   :  { %400 = vmatprep.subr.bf16.mxu1 %v343_v50 }
 0x116   :  { %401 = vmatpush1.bf16.msra.mxu1 %v342_v21 }
 0x117   :  { %481 = vmatmul.mubr.msk.bf16.vlgmr.msra.gmra.mrb[8].mxu0 %vm77_vm0, %v335_v56 }
 0x119   :  { %482 = vmatmul.mubr.msk.bf16.vlgmr.msra.gmra.mrb[8].mxu1 %vm77_vm0, %v335_v56 }
 0x1ea   :  { %v391_v63 = vpop.f32.mrb[8].mxu0 }
 0x1eb   :  { %v392_v0 = vadd.f32 %v391_v63, %v353_v61  ;;  %v393_v1 = vpop.f32.mrb[9].mxu0 }
 0x1ec   :  { %v432_v3 = vpop.f32.mrb[8].mxu1  ;;  %v394_v4 = vadd.f32 %v393_v1, %v353_v61  ;;  %v395_v5 = vpop.f32.mrb[10].mxu0 }
 0x1ed   :  { %v433_v6 = vadd.f32 %v432_v3, %v353_v61  ;;  %v434_v8 = vpop.f32.mrb[9].mxu1  ;;  %v396_v9 = vpop.f32.mrb[11].mxu0 }
 0x1ee   :  { %v443_v10 = vcombine.low %v392_v0, %v394_v4  ;;  %v435_v11 = vadd.f32 %v434_v8, %v353_v61  ;;  %v436_v40 = vpop.f32.mrb[10].mxu1 }
 0x1ef   :  { %v437_v7 = vpop.f32.mrb[11].mxu1 }
 0x1f0   :  { %v451_v12 = vrot.slane %v443_v10, %v450_v2  ;;  %v444_v13 = vcombine.low %v433_v6, %v435_v11 }
 0x1f2   :  { %v458_v14 = vrot.slane %v444_v13, %v450_v2 }
 0x1f4   :  { %v459_v16 = vcombine.low %v451_v12, %v458_v14 }
 0x1f6   :  { %v466_v44 = vrot.slane %v459_v16, %v450_v2 }
 0x1f8   :  { %472 = vst.msk [vmem:[%s767_s5] sm:$0xf] %vm470_vm1, %v466_v44 }

</bundles_post_ra>
